<compile_context>
chip_gen: v5e
topology: v5e:2x2
jax: 0.10.0
libtpu: 0.0.40
codegen_flags: <defaults>
</compile_context>

<pallas_src>
import functools

import jax
import jax.numpy as jnp
from jax import lax
from jax.experimental import pallas as pl
from jax.experimental.pallas import tpu as pltpu


# ----------------------------- helpers ---------------------------------------
def _round_up(x, m):
    return (x + m - 1) // m * m


def _wsilu_ref(x):
    # torch.sigmoid(4*x) * x
    return x * jax.nn.sigmoid(4.0 * x)


def _wsilu_k(x):
    # In-kernel WSiLU: exp and approx-reciprocal both execute on the EUP slot.
    return x * pl.reciprocal(1.0 + jnp.exp(-4.0 * x), approx=True)


def _pick_tile(H2, W2, Cp):
    # Keep one (rows*W2, Cp) f32 plane at <= ~1 MiB; with ~10 live planes plus
    # double-buffered IO this stays well inside VMEM on v5e/v6e (128 MiB) and
    # v7x (64 MiB).  Tile must divide H2 so depthwise boundary masking stays simple.
    budget_rows = max(1, (256 * 1024) // max(W2 * Cp, 1))
    tile = 1
    for d in range(1, H2 + 1):
        if H2 % d == 0 and d <= budget_rows:
            tile = d
    return tile


def _vmem_limit_bytes():
    try:
        return int(pltpu.get_tpu_info().vmem_capacity_bytes) * 3 // 4
    except Exception:
        return None


_VMEM_LIMIT = _vmem_limit_bytes()


# ----------------------------- kernel -----------------------------------------
def _resblock_kernel(TILE, W2, Cp, K2,
                     xc_ref, xu_ref, xd_ref,
                     w_dn_ref, b_dn_ref,
                     w_dc1_ref, b_dc1_ref,
                     w_dw_ref, b_dw_ref,
                     w_dc3_ref, b_dc3_ref,
                     w_f1a_ref, b_f1a_ref,
                     w_f1b_ref, b_f1b_ref,
                     w_f2_ref, b_f2_ref,
                     o_ref):
    R = TILE + 2                       # tile rows + 1 halo row above/below (H2 units)
    t = pl.program_id(1)
    nt = pl.num_programs(1)

    # tile rows + halos: (R, 2, W2, 2*Cin) bf16  (leading-dim concat, tile-aligned)
    xr = jnp.concatenate([xu_ref[0], xc_ref[0], xd_ref[0]], axis=0)

    # --- 2x2 stride-2 "down" conv: two (R*W2, K2) x (K2, Cp) MXU matmuls (kh=0,1) ---
    x0 = xr[:, 0, :, :].reshape(R * W2, K2)
    x1 = xr[:, 1, :, :].reshape(R * W2, K2)
    xdn = (jnp.dot(x0, w_dn_ref[0], preferred_element_type=jnp.float32)
           + jnp.dot(x1, w_dn_ref[1], preferred_element_type=jnp.float32)
           + b_dn_ref[...])                                   # (R*W2, Cp) f32

    # --- dc branch: 1x1 -> WSiLU -> depthwise 3x3 -> 1x1 ---
    y = jnp.dot(xdn.astype(jnp.bfloat16), w_dc1_ref[...],
                preferred_element_type=jnp.float32) + b_dc1_ref[...]
    y = _wsilu_k(y).reshape(R, W2, Cp)

    # zero halo rows that fall outside the image (depthwise zero padding in H)
    rows = lax.broadcasted_iota(jnp.int32, (R, 1, 1), 0)
    pad_row = jnp.logical_or(jnp.logical_and(rows == 0, t == 0),
                             jnp.logical_and(rows == R - 1, t == nt - 1))
    y = jnp.where(pad_row, 0.0, y)

    # column neighbours via XLU roll + edge masks (depthwise zero padding in W)
    cols = lax.broadcasted_iota(jnp.int32, (1, W2, 1), 1)
    y_l = jnp.where(cols > 0, pltpu.roll(y, 1, axis=1), 0.0)           # [w] = y[w-1]
    y_r = jnp.where(cols < W2 - 1, pltpu.roll(y, W2 - 1, axis=1), 0.0)  # [w] = y[w+1]

    acc = jnp.zeros((TILE, W2, Cp), jnp.float32)
    for kh in range(3):
        acc = acc + y_l[kh:kh + TILE] * w_dw_ref[3 * kh + 0]
        acc = acc + y[kh:kh + TILE] * w_dw_ref[3 * kh + 1]
        acc = acc + y_r[kh:kh + TILE] * w_dw_ref[3 * kh + 2]
    ydw = (acc + b_dw_ref[...]).reshape(TILE * W2, Cp)

    y2 = jnp.dot(ydw.astype(jnp.bfloat16), w_dc3_ref[...],
                 preferred_element_type=jnp.float32) + b_dc3_ref[...]

    xc = xdn.reshape(R, W2, Cp)[1:R - 1].reshape(TILE * W2, Cp)   # center rows of down(x)
    tt = y2 + xc                                                  # dc(x) + x

    # --- ffn: two C->2C halves (halved live intermediate), WSiLU, add, 2C->C ---
    t_bf = tt.astype(jnp.bfloat16)
    s = _wsilu_k(jnp.dot(t_bf, w_f1a_ref[...],
                         preferred_element_type=jnp.float32) + b_f1a_ref[...])
    s = s + _wsilu_k(jnp.dot(t_bf, w_f1b_ref[...],
                             preferred_element_type=jnp.float32) + b_f1b_ref[...])
    f = jnp.dot(s.astype(jnp.bfloat16), w_f2_ref[...],
                preferred_element_type=jnp.float32) + b_f2_ref[...]

    out = f + tt + xc                               # ffn(out)+out, then shortcut +x
    o_ref[0] = out.reshape(TILE, W2, Cp).astype(o_ref.dtype)


# ----------------------------- wrapper -----------------------------------------
@jax.jit
def resblock_with_stride2_pallas(x_nchw, p):
    N, Cin, H, W = x_nchw.shape
    H2, W2 = H // 2, W // 2
    C = p['down_w'].shape[0]
    Cp = _round_up(C, 128)             # lane-dense channels
    K2 = 2 * Cin                       # per-kernel-row contraction (kw, ci)

    # channels-last input; pure contiguous reshape (no extra HBM pass for im2col)
    x_nhwc = jnp.transpose(x_nchw, (0, 2, 3, 1))
    xr = x_nhwc.reshape(N, H2, 2, W2, K2).astype(jnp.bfloat16)

    # ---- PyTorch weights -> channels-last matmul form, zero-padded to Cp lanes ----
    def padw(w, rows, cols):
        return jnp.pad(w, ((0, rows - w.shape[0]), (0, cols - w.shape[1])))

    def padb(b, n):
        return jnp.pad(b, (0, n - b.shape[0])).reshape(1, n).astype(jnp.float32)

    w_dn = jnp.transpose(p['down_w'], (2, 3, 1, 0)).reshape(2, K2, C)   # (kh, kw*ci, co)
    w_dn = jnp.pad(w_dn, ((0, 0), (0, 0), (0, Cp - C))).astype(jnp.bfloat16)
    b_dn = padb(p['down_b'], Cp)

    w_dc1 = padw(p['dc1_w'][:, :, 0, 0].T, Cp, Cp).astype(jnp.bfloat16)
    b_dc1 = padb(p['dc1_b'], Cp)

    w_dw = jnp.transpose(p['dw_w'][:, 0], (1, 2, 0)).reshape(9, C)      # (kh*3+kw, c)
    w_dw = jnp.pad(w_dw, ((0, 0), (0, Cp - C))).reshape(9, 1, Cp).astype(jnp.float32)
    b_dw = padb(p['dw_b'], Cp)

    w_dc3 = padw(p['dc3_w'][:, :, 0, 0].T, Cp, Cp).astype(jnp.bfloat16)
    b_dc3 = padb(p['dc3_b'], Cp)

    w_f1 = p['ffn1_w'][:, :, 0, 0].T                                    # (C, 4C)
    w_f1a = padw(w_f1[:, :2 * C], Cp, 2 * Cp).astype(jnp.bfloat16)
    w_f1b = padw(w_f1[:, 2 * C:], Cp, 2 * Cp).astype(jnp.bfloat16)
    b_f1a = padb(p['ffn1_b'][:2 * C], 2 * Cp)
    b_f1b = padb(p['ffn1_b'][2 * C:], 2 * Cp)

    w_f2 = padw(p['ffn2_w'][:, :, 0, 0].T, 2 * Cp, Cp).astype(jnp.bfloat16)
    b_f2 = padb(p['ffn2_b'], Cp)

    TILE = _pick_tile(H2, W2, Cp)
    T = H2 // TILE

    kernel = functools.partial(_resblock_kernel, TILE, W2, Cp, K2)

    def _const(a):
        nd = a.ndim
        return pl.BlockSpec(a.shape, lambda n, t, _nd=nd: (0,) * _nd)

    spec_center = pl.BlockSpec((1, TILE, 2, W2, K2), lambda n, t: (n, t, 0, 0, 0))
    spec_up = pl.BlockSpec((1, 1, 2, W2, K2),
                           lambda n, t: (n, jnp.maximum(t * TILE - 1, 0), 0, 0, 0))
    spec_dn = pl.BlockSpec((1, 1, 2, W2, K2),
                           lambda n, t: (n, jnp.minimum((t + 1) * TILE, H2 - 1), 0, 0, 0))

    out = pl.pallas_call(
        kernel,
        out_shape=jax.ShapeDtypeStruct((N, H2, W2, Cp), jnp.float32),
        grid=(N, T),
        in_specs=[spec_center, spec_up, spec_dn,
                  _const(w_dn), _const(b_dn),
                  _const(w_dc1), _const(b_dc1),
                  _const(w_dw), _const(b_dw),
                  _const(w_dc3), _const(b_dc3),
                  _const(w_f1a), _const(b_f1a),
                  _const(w_f1b), _const(b_f1b),
                  _const(w_f2), _const(b_f2)],
        out_specs=pl.BlockSpec((1, TILE, W2, Cp), lambda n, t: (n, t, 0, 0)),
        compiler_params=pltpu.CompilerParams(
            dimension_semantics=("parallel", "parallel"),
            vmem_limit_bytes=_VMEM_LIMIT),
    )(xr, xr, xr,
      w_dn, b_dn, w_dc1, b_dc1, w_dw, b_dw, w_dc3, b_dc3,
      w_f1a, b_f1a, w_f1b, b_f1b, w_f2, b_f2)

    out = out[..., :C].astype(x_nchw.dtype)          # drop padded lanes
    return jnp.transpose(out, (0, 3, 1, 2))          # back to NCHW


# ---------------- pure-JAX f32 reference (for correctness check) ----------------
def _conv2d_ref(x, w, b, stride=1, padding=0, groups=1):
    out = lax.conv_general_dilated(
        x, w, window_strides=(stride, stride),
        padding=[(padding, padding), (padding, padding)],
        dimension_numbers=('NCHW', 'OIHW', 'NCHW'),
        feature_group_count=groups)
    return out + b[None, :, None, None]


def resblock_with_stride2_ref(x, p):
    x = _conv2d_ref(x, p['down_w'], p['down_b'], stride=2)
    y = _conv2d_ref(x, p['dc1_w'], p['dc1_b'])
    y = _wsilu_ref(y)
    y = _conv2d_ref(y, p['dw_w'], p['dw_b'], padding=1, groups=p['dw_w'].shape[0])
    y = _conv2d_ref(y, p['dc3_w'], p['dc3_b'])
    t = y + x
    u = _conv2d_ref(t, p['ffn1_w'], p['ffn1_b'])
    u = _wsilu_ref(u)
    half = u.shape[1] // 2
    s = u[:, :half] + u[:, half:]
    f = _conv2d_ref(s, p['ffn2_w'], p['ffn2_b'])
    return f + t + x


def _make_params(key, in_ch, out_ch):
    ks = jax.random.split(key, 12)
    n = lambda k, shape: (0.1 * jax.random.normal(k, shape)).astype(jnp.float32)
    return dict(
        down_w=n(ks[0], (out_ch, in_ch, 2, 2)),   down_b=n(ks[1], (out_ch,)),
        dc1_w=n(ks[2], (out_ch, out_ch, 1, 1)),   dc1_b=n(ks[3], (out_ch,)),
        dw_w=n(ks[4], (out_ch, 1, 3, 3)),         dw_b=n(ks[5], (out_ch,)),
        dc3_w=n(ks[6], (out_ch, out_ch, 1, 1)),   dc3_b=n(ks[7], (out_ch,)),
        ffn1_w=n(ks[8], (out_ch * 4, out_ch, 1, 1)), ffn1_b=n(ks[9], (out_ch * 4,)),
        ffn2_w=n(ks[10], (out_ch, out_ch * 2, 1, 1)), ffn2_b=n(ks[11], (out_ch,)),
    )


if __name__ == "__main__":
    key = jax.random.PRNGKey(0)
    k_x, k_p = jax.random.split(key)

    N, in_ch, out_ch, H, W = 2, 4, 4, 16, 16
    x = jax.random.normal(k_x, (N, in_ch, H, W), dtype=jnp.float32)
    params = _make_params(k_p, in_ch, out_ch)

    out = jax.block_until_ready(resblock_with_stride2_pallas(x, params))
    ref = jax.block_until_ready(resblock_with_stride2_ref(x, params))

    assert out.shape == (N, out_ch, H // 2, W // 2), out.shape
    # bf16 MXU inputs + approx reciprocal -> loosened tolerance vs the f32 reference
    err = float(jnp.max(jnp.abs(out - ref)))
    assert err < 5e-2, err

    print("KERNEL_OK")
</pallas_src>

<mosaic_0001>
module attributes {stable_mosaic.version = 11 : i64} {
  func.func @_resblock_kernel(%arg0: i32, %arg1: i32, %arg2: memref<1x8x2x8x8xbf16, #tpu.memory_space<vmem>>, %arg3: memref<1x1x2x8x8xbf16, #tpu.memory_space<vmem>>, %arg4: memref<1x1x2x8x8xbf16, #tpu.memory_space<vmem>>, %arg5: memref<2x8x128xbf16, #tpu.memory_space<vmem>>, %arg6: memref<1x128xf32, #tpu.memory_space<vmem>>, %arg7: memref<128x128xbf16, #tpu.memory_space<vmem>>, %arg8: memref<1x128xf32, #tpu.memory_space<vmem>>, %arg9: memref<9x1x128xf32, #tpu.memory_space<vmem>>, %arg10: memref<1x128xf32, #tpu.memory_space<vmem>>, %arg11: memref<128x128xbf16, #tpu.memory_space<vmem>>, %arg12: memref<1x128xf32, #tpu.memory_space<vmem>>, %arg13: memref<128x256xbf16, #tpu.memory_space<vmem>>, %arg14: memref<1x256xf32, #tpu.memory_space<vmem>>, %arg15: memref<128x256xbf16, #tpu.memory_space<vmem>>, %arg16: memref<1x256xf32, #tpu.memory_space<vmem>>, %arg17: memref<256x128xbf16, #tpu.memory_space<vmem>>, %arg18: memref<1x128xf32, #tpu.memory_space<vmem>>, %arg19: memref<1x8x8x128xf32, #tpu.memory_space<vmem>>) attributes {dimension_semantics = [#tpu.dimension_semantics<parallel>, #tpu.dimension_semantics<parallel>], iteration_bounds = array<i64: 2, 1>, scalar_prefetch = 0 : i64, scratch_operands = 0 : i64, tpu.core_type = #tpu.core_type<tc>, window_params = [{transform_indices = @transform_0, window_bounds = array<i64: 1, 8, 2, 8, 8>}, {transform_indices = @transform_1, window_bounds = array<i64: 1, 1, 2, 8, 8>}, {transform_indices = @transform_2, window_bounds = array<i64: 1, 1, 2, 8, 8>}, {pipeline_mode = #tpu.pipeline_mode<synchronous>, transform_indices = @transform_3, window_bounds = array<i64: 2, 8, 128>}, {pipeline_mode = #tpu.pipeline_mode<synchronous>, transform_indices = @transform_4, window_bounds = array<i64: 1, 128>}, {pipeline_mode = #tpu.pipeline_mode<synchronous>, transform_indices = @transform_5, window_bounds = array<i64: 128, 128>}, {pipeline_mode = #tpu.pipeline_mode<synchronous>, transform_indices = @transform_6, window_bounds = array<i64: 1, 128>}, {pipeline_mode = #tpu.pipeline_mode<synchronous>, transform_indices = @transform_7, window_bounds = array<i64: 9, 1, 128>}, {pipeline_mode = #tpu.pipeline_mode<synchronous>, transform_indices = @transform_8, window_bounds = array<i64: 1, 128>}, {pipeline_mode = #tpu.pipeline_mode<synchronous>, transform_indices = @transform_9, window_bounds = array<i64: 128, 128>}, {pipeline_mode = #tpu.pipeline_mode<synchronous>, transform_indices = @transform_10, window_bounds = array<i64: 1, 128>}, {pipeline_mode = #tpu.pipeline_mode<synchronous>, transform_indices = @transform_11, window_bounds = array<i64: 128, 256>}, {pipeline_mode = #tpu.pipeline_mode<synchronous>, transform_indices = @transform_12, window_bounds = array<i64: 1, 256>}, {pipeline_mode = #tpu.pipeline_mode<synchronous>, transform_indices = @transform_13, window_bounds = array<i64: 128, 256>}, {pipeline_mode = #tpu.pipeline_mode<synchronous>, transform_indices = @transform_14, window_bounds = array<i64: 1, 256>}, {pipeline_mode = #tpu.pipeline_mode<synchronous>, transform_indices = @transform_15, window_bounds = array<i64: 256, 128>}, {pipeline_mode = #tpu.pipeline_mode<synchronous>, transform_indices = @transform_16, window_bounds = array<i64: 1, 128>}, {transform_indices = @transform_17, window_bounds = array<i64: 1, 8, 8, 128>}]} {
    %c0 = arith.constant 0 : index
    %c0_0 = arith.constant 0 : index
    %c0_1 = arith.constant 0 : index
    %c0_2 = arith.constant 0 : index
    %c0_3 = arith.constant 0 : index
    %0 = vector.load %arg3[%c0, %c0_0, %c0_1, %c0_2, %c0_3] : memref<1x1x2x8x8xbf16, #tpu.memory_space<vmem>>, vector<1x1x2x8x8xbf16>
    %1 = vector.shape_cast %0 : vector<1x1x2x8x8xbf16> to vector<1x2x8x8xbf16>
    %c0_4 = arith.constant 0 : index
    %c0_5 = arith.constant 0 : index
    %c0_6 = arith.constant 0 : index
    %c0_7 = arith.constant 0 : index
    %c0_8 = arith.constant 0 : index
    %2 = vector.load %arg2[%c0_4, %c0_5, %c0_6, %c0_7, %c0_8] : memref<1x8x2x8x8xbf16, #tpu.memory_space<vmem>>, vector<1x8x2x8x8xbf16>
    %3 = vector.shape_cast %2 : vector<1x8x2x8x8xbf16> to vector<8x2x8x8xbf16>
    %c0_9 = arith.constant 0 : index
    %c0_10 = arith.constant 0 : index
    %c0_11 = arith.constant 0 : index
    %c0_12 = arith.constant 0 : index
    %c0_13 = arith.constant 0 : index
    %4 = vector.load %arg4[%c0_9, %c0_10, %c0_11, %c0_12, %c0_13] : memref<1x1x2x8x8xbf16, #tpu.memory_space<vmem>>, vector<1x1x2x8x8xbf16>
    %5 = vector.shape_cast %4 : vector<1x1x2x8x8xbf16> to vector<1x2x8x8xbf16>
    %6 = tpu.concatenate %1, %3, %5 in 0 : vector<1x2x8x8xbf16>, vector<8x2x8x8xbf16>, vector<1x2x8x8xbf16> -> vector<10x2x8x8xbf16>
    %7 = vector.extract_strided_slice %6 {offsets = [0, 0, 0, 0], sizes = [10, 1, 8, 8], strides = [1, 1, 1, 1]} : vector<10x2x8x8xbf16> to vector<10x1x8x8xbf16>
    %8 = vector.shape_cast %7 : vector<10x1x8x8xbf16> to vector<10x8x8xbf16>
    %9 = vector.shape_cast %8 : vector<10x8x8xbf16> to vector<80x8xbf16>
    %10 = vector.extract_strided_slice %6 {offsets = [0, 1, 0, 0], sizes = [10, 1, 8, 8], strides = [1, 1, 1, 1]} : vector<10x2x8x8xbf16> to vector<10x1x8x8xbf16>
    %11 = vector.shape_cast %10 : vector<10x1x8x8xbf16> to vector<10x8x8xbf16>
    %12 = vector.shape_cast %11 : vector<10x8x8xbf16> to vector<80x8xbf16>
    %c0_14 = arith.constant 0 : index
    %c0_15 = arith.constant 0 : index
    %c0_16 = arith.constant 0 : index
    %13 = vector.load %arg5[%c0_14, %c0_15, %c0_16] : memref<2x8x128xbf16, #tpu.memory_space<vmem>>, vector<1x8x128xbf16>
    %14 = vector.shape_cast %13 : vector<1x8x128xbf16> to vector<8x128xbf16>
    %cst = arith.constant dense<0.000000e+00> : vector<80x128xf32>
    %15 = tpu.matmul %9, %14, %cst {dimension_numbers = #tpu.dot_dimension_numbers<[1], [0], [0], [1], [0, 0, 1, 1], [], []>} : vector<80x8xbf16>, vector<8x128xbf16>, vector<80x128xf32> -> vector<80x128xf32>
    %c1 = arith.constant 1 : index
    %c0_17 = arith.constant 0 : index
    %c0_18 = arith.constant 0 : index
    %16 = vector.load %arg5[%c1, %c0_17, %c0_18] : memref<2x8x128xbf16, #tpu.memory_space<vmem>>, vector<1x8x128xbf16>
    %17 = vector.shape_cast %16 : vector<1x8x128xbf16> to vector<8x128xbf16>
    %cst_19 = arith.constant dense<0.000000e+00> : vector<80x128xf32>
    %18 = tpu.matmul %12, %17, %cst_19 {dimension_numbers = #tpu.dot_dimension_numbers<[1], [0], [0], [1], [0, 0, 1, 1], [], []>} : vector<80x8xbf16>, vector<8x128xbf16>, vector<80x128xf32> -> vector<80x128xf32>
    %19 = arith.addf %15, %18 : vector<80x128xf32>
    %c0_20 = arith.constant 0 : index
    %c0_21 = arith.constant 0 : index
    %20 = vector.load %arg6[%c0_20, %c0_21] : memref<1x128xf32, #tpu.memory_space<vmem>>, vector<1x128xf32>
    %21 = vector.broadcast %20 : vector<1x128xf32> to vector<80x128xf32>
    %22 = arith.addf %19, %21 : vector<80x128xf32>
    %23 = arith.truncf %22 : vector<80x128xf32> to vector<80x128xbf16>
    %c0_22 = arith.constant 0 : index
    %c0_23 = arith.constant 0 : index
    %24 = vector.load %arg7[%c0_22, %c0_23] : memref<128x128xbf16, #tpu.memory_space<vmem>>, vector<128x128xbf16>
    %cst_24 = arith.constant dense<0.000000e+00> : vector<80x128xf32>
    %25 = tpu.matmul %23, %24, %cst_24 {dimension_numbers = #tpu.dot_dimension_numbers<[1], [0], [0], [1], [0, 0, 1, 1], [], []>} : vector<80x128xbf16>, vector<128x128xbf16>, vector<80x128xf32> -> vector<80x128xf32>
    %c0_25 = arith.constant 0 : index
    %c0_26 = arith.constant 0 : index
    %26 = vector.load %arg8[%c0_25, %c0_26] : memref<1x128xf32, #tpu.memory_space<vmem>>, vector<1x128xf32>
    %27 = vector.broadcast %26 : vector<1x128xf32> to vector<80x128xf32>
    %28 = arith.addf %25, %27 : vector<80x128xf32>
    %cst_27 = arith.constant -4.000000e+00 : f32
    %29 = vector.broadcast %cst_27 : f32 to vector<80x128xf32>
    %30 = arith.mulf %29, %28 : vector<80x128xf32>
    %31 = math.exp %30 : vector<80x128xf32>
    %cst_28 = arith.constant 1.000000e+00 : f32
    %32 = vector.broadcast %cst_28 : f32 to vector<80x128xf32>
    %33 = arith.addf %32, %31 : vector<80x128xf32>
    %34 = tpu.reciprocal %33 {approx = true} : vector<80x128xf32> -> vector<80x128xf32>
    %35 = arith.mulf %28, %34 : vector<80x128xf32>
    %36 = vector.shape_cast %35 : vector<80x128xf32> to vector<10x8x128xf32>
    %37 = tpu.iota {dimensions = array<i32: 0>} : vector<10x1x1xi32>
    %c0_i32 = arith.constant 0 : i32
    %38 = vector.broadcast %c0_i32 : i32 to vector<10x1x1xi32>
    %39 = arith.cmpi eq, %37, %38 : vector<10x1x1xi32>
    %c0_i32_29 = arith.constant 0 : i32
    %40 = arith.cmpi eq, %arg1, %c0_i32_29 : i32
    %41 = vector.broadcast %40 : i1 to vector<10x1x1xi1>
    %42 = arith.andi %39, %41 : vector<10x1x1xi1>
    %c9_i32 = arith.constant 9 : i32
    %43 = vector.broadcast %c9_i32 : i32 to vector<10x1x1xi32>
    %44 = arith.cmpi eq, %37, %43 : vector<10x1x1xi32>
    %c0_i32_30 = arith.constant 0 : i32
    %45 = arith.cmpi eq, %arg1, %c0_i32_30 : i32
    %46 = vector.broadcast %45 : i1 to vector<10x1x1xi1>
    %47 = arith.andi %44, %46 : vector<10x1x1xi1>
    %48 = arith.ori %42, %47 : vector<10x1x1xi1>
    %cst_31 = arith.constant 0.000000e+00 : f32
    %49 = vector.shape_cast %48 : vector<10x1x1xi1> to vector<10x1x1xi1>
    %50 = vector.broadcast %49 : vector<10x1x1xi1> to vector<10x8x128xi1>
    %51 = vector.broadcast %cst_31 : f32 to vector<10x8x128xf32>
    %52 = arith.select %50, %51, %36 : vector<10x8x128xi1>, vector<10x8x128xf32>
    %53 = tpu.iota {dimensions = array<i32: 1>} : vector<1x8x1xi32>
    %c0_i32_32 = arith.constant 0 : i32
    %54 = vector.broadcast %c0_i32_32 : i32 to vector<1x8x1xi32>
    %55 = arith.cmpi sgt, %53, %54 : vector<1x8x1xi32>
    %c1_i32 = arith.constant 1 : i32
    %56 = tpu.dynamic_rotate %52 by %c1_i32 dim 1 : vector<10x8x128xf32>, i32 -> vector<10x8x128xf32>
    %cst_33 = arith.constant 0.000000e+00 : f32
    %57 = vector.shape_cast %55 : vector<1x8x1xi1> to vector<1x8x1xi1>
    %58 = vector.broadcast %57 : vector<1x8x1xi1> to vector<10x8x128xi1>
    %59 = vector.broadcast %cst_33 : f32 to vector<10x8x128xf32>
    %60 = arith.select %58, %56, %59 : vector<10x8x128xi1>, vector<10x8x128xf32>
    %c7_i32 = arith.constant 7 : i32
    %61 = vector.broadcast %c7_i32 : i32 to vector<1x8x1xi32>
    %62 = arith.cmpi slt, %53, %61 : vector<1x8x1xi32>
    %c7_i32_34 = arith.constant 7 : i32
    %63 = tpu.dynamic_rotate %52 by %c7_i32_34 dim 1 : vector<10x8x128xf32>, i32 -> vector<10x8x128xf32>
    %cst_35 = arith.constant 0.000000e+00 : f32
    %64 = vector.shape_cast %62 : vector<1x8x1xi1> to vector<1x8x1xi1>
    %65 = vector.broadcast %64 : vector<1x8x1xi1> to vector<10x8x128xi1>
    %66 = vector.broadcast %cst_35 : f32 to vector<10x8x128xf32>
    %67 = arith.select %65, %63, %66 : vector<10x8x128xi1>, vector<10x8x128xf32>
    %cst_36 = arith.constant 0.000000e+00 : f32
    %68 = vector.broadcast %cst_36 : f32 to vector<8x8x128xf32>
    %69 = vector.extract_strided_slice %60 {offsets = [0, 0, 0], sizes = [8, 8, 128], strides = [1, 1, 1]} : vector<10x8x128xf32> to vector<8x8x128xf32>
    %c0_37 = arith.constant 0 : index
    %c0_38 = arith.constant 0 : index
    %c0_39 = arith.constant 0 : index
    %70 = vector.load %arg9[%c0_37, %c0_38, %c0_39] : memref<9x1x128xf32, #tpu.memory_space<vmem>>, vector<1x1x128xf32>
    %71 = vector.shape_cast %70 : vector<1x1x128xf32> to vector<1x128xf32>
    %72 = vector.shape_cast %71 : vector<1x128xf32> to vector<1x1x128xf32>
    %73 = vector.broadcast %72 : vector<1x1x128xf32> to vector<8x8x128xf32>
    %74 = arith.mulf %69, %73 : vector<8x8x128xf32>
    %75 = arith.addf %68, %74 : vector<8x8x128xf32>
    %76 = vector.extract_strided_slice %52 {offsets = [0, 0, 0], sizes = [8, 8, 128], strides = [1, 1, 1]} : vector<10x8x128xf32> to vector<8x8x128xf32>
    %c1_40 = arith.constant 1 : index
    %c0_41 = arith.constant 0 : index
    %c0_42 = arith.constant 0 : index
    %77 = vector.load %arg9[%c1_40, %c0_41, %c0_42] : memref<9x1x128xf32, #tpu.memory_space<vmem>>, vector<1x1x128xf32>
    %78 = vector.shape_cast %77 : vector<1x1x128xf32> to vector<1x128xf32>
    %79 = vector.shape_cast %78 : vector<1x128xf32> to vector<1x1x128xf32>
    %80 = vector.broadcast %79 : vector<1x1x128xf32> to vector<8x8x128xf32>
    %81 = arith.mulf %76, %80 : vector<8x8x128xf32>
    %82 = arith.addf %75, %81 : vector<8x8x128xf32>
    %83 = vector.extract_strided_slice %67 {offsets = [0, 0, 0], sizes = [8, 8, 128], strides = [1, 1, 1]} : vector<10x8x128xf32> to vector<8x8x128xf32>
    %c2 = arith.constant 2 : index
    %c0_43 = arith.constant 0 : index
    %c0_44 = arith.constant 0 : index
    %84 = vector.load %arg9[%c2, %c0_43, %c0_44] : memref<9x1x128xf32, #tpu.memory_space<vmem>>, vector<1x1x128xf32>
    %85 = vector.shape_cast %84 : vector<1x1x128xf32> to vector<1x128xf32>
    %86 = vector.shape_cast %85 : vector<1x128xf32> to vector<1x1x128xf32>
    %87 = vector.broadcast %86 : vector<1x1x128xf32> to vector<8x8x128xf32>
    %88 = arith.mulf %83, %87 : vector<8x8x128xf32>
    %89 = arith.addf %82, %88 : vector<8x8x128xf32>
    %90 = vector.extract_strided_slice %60 {offsets = [1, 0, 0], sizes = [8, 8, 128], strides = [1, 1, 1]} : vector<10x8x128xf32> to vector<8x8x128xf32>
    %c3 = arith.constant 3 : index
    %c0_45 = arith.constant 0 : index
    %c0_46 = arith.constant 0 : index
    %91 = vector.load %arg9[%c3, %c0_45, %c0_46] : memref<9x1x128xf32, #tpu.memory_space<vmem>>, vector<1x1x128xf32>
    %92 = vector.shape_cast %91 : vector<1x1x128xf32> to vector<1x128xf32>
    %93 = vector.shape_cast %92 : vector<1x128xf32> to vector<1x1x128xf32>
    %94 = vector.broadcast %93 : vector<1x1x128xf32> to vector<8x8x128xf32>
    %95 = arith.mulf %90, %94 : vector<8x8x128xf32>
    %96 = arith.addf %89, %95 : vector<8x8x128xf32>
    %97 = vector.extract_strided_slice %52 {offsets = [1, 0, 0], sizes = [8, 8, 128], strides = [1, 1, 1]} : vector<10x8x128xf32> to vector<8x8x128xf32>
    %c4 = arith.constant 4 : index
    %c0_47 = arith.constant 0 : index
    %c0_48 = arith.constant 0 : index
    %98 = vector.load %arg9[%c4, %c0_47, %c0_48] : memref<9x1x128xf32, #tpu.memory_space<vmem>>, vector<1x1x128xf32>
    %99 = vector.shape_cast %98 : vector<1x1x128xf32> to vector<1x128xf32>
    %100 = vector.shape_cast %99 : vector<1x128xf32> to vector<1x1x128xf32>
    %101 = vector.broadcast %100 : vector<1x1x128xf32> to vector<8x8x128xf32>
    %102 = arith.mulf %97, %101 : vector<8x8x128xf32>
    %103 = arith.addf %96, %102 : vector<8x8x128xf32>
    %104 = vector.extract_strided_slice %67 {offsets = [1, 0, 0], sizes = [8, 8, 128], strides = [1, 1, 1]} : vector<10x8x128xf32> to vector<8x8x128xf32>
    %c5 = arith.constant 5 : index
    %c0_49 = arith.constant 0 : index
    %c0_50 = arith.constant 0 : index
    %105 = vector.load %arg9[%c5, %c0_49, %c0_50] : memref<9x1x128xf32, #tpu.memory_space<vmem>>, vector<1x1x128xf32>
    %106 = vector.shape_cast %105 : vector<1x1x128xf32> to vector<1x128xf32>
    %107 = vector.shape_cast %106 : vector<1x128xf32> to vector<1x1x128xf32>
    %108 = vector.broadcast %107 : vector<1x1x128xf32> to vector<8x8x128xf32>
    %109 = arith.mulf %104, %108 : vector<8x8x128xf32>
    %110 = arith.addf %103, %109 : vector<8x8x128xf32>
    %111 = vector.extract_strided_slice %60 {offsets = [2, 0, 0], sizes = [8, 8, 128], strides = [1, 1, 1]} : vector<10x8x128xf32> to vector<8x8x128xf32>
    %c6 = arith.constant 6 : index
    %c0_51 = arith.constant 0 : index
    %c0_52 = arith.constant 0 : index
    %112 = vector.load %arg9[%c6, %c0_51, %c0_52] : memref<9x1x128xf32, #tpu.memory_space<vmem>>, vector<1x1x128xf32>
    %113 = vector.shape_cast %112 : vector<1x1x128xf32> to vector<1x128xf32>
    %114 = vector.shape_cast %113 : vector<1x128xf32> to vector<1x1x128xf32>
    %115 = vector.broadcast %114 : vector<1x1x128xf32> to vector<8x8x128xf32>
    %116 = arith.mulf %111, %115 : vector<8x8x128xf32>
    %117 = arith.addf %110, %116 : vector<8x8x128xf32>
    %118 = vector.extract_strided_slice %52 {offsets = [2, 0, 0], sizes = [8, 8, 128], strides = [1, 1, 1]} : vector<10x8x128xf32> to vector<8x8x128xf32>
    %c7 = arith.constant 7 : index
    %c0_53 = arith.constant 0 : index
    %c0_54 = arith.constant 0 : index
    %119 = vector.load %arg9[%c7, %c0_53, %c0_54] : memref<9x1x128xf32, #tpu.memory_space<vmem>>, vector<1x1x128xf32>
    %120 = vector.shape_cast %119 : vector<1x1x128xf32> to vector<1x128xf32>
    %121 = vector.shape_cast %120 : vector<1x128xf32> to vector<1x1x128xf32>
    %122 = vector.broadcast %121 : vector<1x1x128xf32> to vector<8x8x128xf32>
    %123 = arith.mulf %118, %122 : vector<8x8x128xf32>
    %124 = arith.addf %117, %123 : vector<8x8x128xf32>
    %125 = vector.extract_strided_slice %67 {offsets = [2, 0, 0], sizes = [8, 8, 128], strides = [1, 1, 1]} : vector<10x8x128xf32> to vector<8x8x128xf32>
    %c8 = arith.constant 8 : index
    %c0_55 = arith.constant 0 : index
    %c0_56 = arith.constant 0 : index
    %126 = vector.load %arg9[%c8, %c0_55, %c0_56] : memref<9x1x128xf32, #tpu.memory_space<vmem>>, vector<1x1x128xf32>
    %127 = vector.shape_cast %126 : vector<1x1x128xf32> to vector<1x128xf32>
    %128 = vector.shape_cast %127 : vector<1x128xf32> to vector<1x1x128xf32>
    %129 = vector.broadcast %128 : vector<1x1x128xf32> to vector<8x8x128xf32>
    %130 = arith.mulf %125, %129 : vector<8x8x128xf32>
    %131 = arith.addf %124, %130 : vector<8x8x128xf32>
    %c0_57 = arith.constant 0 : index
    %c0_58 = arith.constant 0 : index
    %132 = vector.load %arg10[%c0_57, %c0_58] : memref<1x128xf32, #tpu.memory_space<vmem>>, vector<1x128xf32>
    %133 = vector.shape_cast %132 : vector<1x128xf32> to vector<1x1x128xf32>
    %134 = vector.broadcast %133 : vector<1x1x128xf32> to vector<8x8x128xf32>
    %135 = arith.addf %131, %134 : vector<8x8x128xf32>
    %136 = vector.shape_cast %135 : vector<8x8x128xf32> to vector<64x128xf32>
    %137 = arith.truncf %136 : vector<64x128xf32> to vector<64x128xbf16>
    %c0_59 = arith.constant 0 : index
    %c0_60 = arith.constant 0 : index
    %138 = vector.load %arg11[%c0_59, %c0_60] : memref<128x128xbf16, #tpu.memory_space<vmem>>, vector<128x128xbf16>
    %cst_61 = arith.constant dense<0.000000e+00> : vector<64x128xf32>
    %139 = tpu.matmul %137, %138, %cst_61 {dimension_numbers = #tpu.dot_dimension_numbers<[1], [0], [0], [1], [0, 0, 1, 1], [], []>} : vector<64x128xbf16>, vector<128x128xbf16>, vector<64x128xf32> -> vector<64x128xf32>
    %c0_62 = arith.constant 0 : index
    %c0_63 = arith.constant 0 : index
    %140 = vector.load %arg12[%c0_62, %c0_63] : memref<1x128xf32, #tpu.memory_space<vmem>>, vector<1x128xf32>
    %141 = vector.broadcast %140 : vector<1x128xf32> to vector<64x128xf32>
    %142 = arith.addf %139, %141 : vector<64x128xf32>
    %143 = vector.shape_cast %22 : vector<80x128xf32> to vector<10x8x128xf32>
    %144 = vector.extract_strided_slice %143 {offsets = [1, 0, 0], sizes = [8, 8, 128], strides = [1, 1, 1]} : vector<10x8x128xf32> to vector<8x8x128xf32>
    %145 = vector.shape_cast %144 : vector<8x8x128xf32> to vector<64x128xf32>
    %146 = arith.addf %142, %145 : vector<64x128xf32>
    %147 = arith.truncf %146 : vector<64x128xf32> to vector<64x128xbf16>
    %c0_64 = arith.constant 0 : index
    %c0_65 = arith.constant 0 : index
    %148 = vector.load %arg13[%c0_64, %c0_65] : memref<128x256xbf16, #tpu.memory_space<vmem>>, vector<128x256xbf16>
    %cst_66 = arith.constant dense<0.000000e+00> : vector<64x256xf32>
    %149 = tpu.matmul %147, %148, %cst_66 {dimension_numbers = #tpu.dot_dimension_numbers<[1], [0], [0], [1], [0, 0, 1, 1], [], []>} : vector<64x128xbf16>, vector<128x256xbf16>, vector<64x256xf32> -> vector<64x256xf32>
    %c0_67 = arith.constant 0 : index
    %c0_68 = arith.constant 0 : index
    %150 = vector.load %arg14[%c0_67, %c0_68] : memref<1x256xf32, #tpu.memory_space<vmem>>, vector<1x256xf32>
    %151 = vector.broadcast %150 : vector<1x256xf32> to vector<64x256xf32>
    %152 = arith.addf %149, %151 : vector<64x256xf32>
    %cst_69 = arith.constant -4.000000e+00 : f32
    %153 = vector.broadcast %cst_69 : f32 to vector<64x256xf32>
    %154 = arith.mulf %153, %152 : vector<64x256xf32>
    %155 = math.exp %154 : vector<64x256xf32>
    %cst_70 = arith.constant 1.000000e+00 : f32
    %156 = vector.broadcast %cst_70 : f32 to vector<64x256xf32>
    %157 = arith.addf %156, %155 : vector<64x256xf32>
    %158 = tpu.reciprocal %157 {approx = true} : vector<64x256xf32> -> vector<64x256xf32>
    %159 = arith.mulf %152, %158 : vector<64x256xf32>
    %c0_71 = arith.constant 0 : index
    %c0_72 = arith.constant 0 : index
    %160 = vector.load %arg15[%c0_71, %c0_72] : memref<128x256xbf16, #tpu.memory_space<vmem>>, vector<128x256xbf16>
    %cst_73 = arith.constant dense<0.000000e+00> : vector<64x256xf32>
    %161 = tpu.matmul %147, %160, %cst_73 {dimension_numbers = #tpu.dot_dimension_numbers<[1], [0], [0], [1], [0, 0, 1, 1], [], []>} : vector<64x128xbf16>, vector<128x256xbf16>, vector<64x256xf32> -> vector<64x256xf32>
    %c0_74 = arith.constant 0 : index
    %c0_75 = arith.constant 0 : index
    %162 = vector.load %arg16[%c0_74, %c0_75] : memref<1x256xf32, #tpu.memory_space<vmem>>, vector<1x256xf32>
    %163 = vector.broadcast %162 : vector<1x256xf32> to vector<64x256xf32>
    %164 = arith.addf %161, %163 : vector<64x256xf32>
    %cst_76 = arith.constant -4.000000e+00 : f32
    %165 = vector.broadcast %cst_76 : f32 to vector<64x256xf32>
    %166 = arith.mulf %165, %164 : vector<64x256xf32>
    %167 = math.exp %166 : vector<64x256xf32>
    %cst_77 = arith.constant 1.000000e+00 : f32
    %168 = vector.broadcast %cst_77 : f32 to vector<64x256xf32>
    %169 = arith.addf %168, %167 : vector<64x256xf32>
    %170 = tpu.reciprocal %169 {approx = true} : vector<64x256xf32> -> vector<64x256xf32>
    %171 = arith.mulf %164, %170 : vector<64x256xf32>
    %172 = arith.addf %159, %171 : vector<64x256xf32>
    %173 = arith.truncf %172 : vector<64x256xf32> to vector<64x256xbf16>
    %c0_78 = arith.constant 0 : index
    %c0_79 = arith.constant 0 : index
    %174 = vector.load %arg17[%c0_78, %c0_79] : memref<256x128xbf16, #tpu.memory_space<vmem>>, vector<256x128xbf16>
    %cst_80 = arith.constant dense<0.000000e+00> : vector<64x128xf32>
    %175 = tpu.matmul %173, %174, %cst_80 {dimension_numbers = #tpu.dot_dimension_numbers<[1], [0], [0], [1], [0, 0, 1, 1], [], []>} : vector<64x256xbf16>, vector<256x128xbf16>, vector<64x128xf32> -> vector<64x128xf32>
    %c0_81 = arith.constant 0 : index
    %c0_82 = arith.constant 0 : index
    %176 = vector.load %arg18[%c0_81, %c0_82] : memref<1x128xf32, #tpu.memory_space<vmem>>, vector<1x128xf32>
    %177 = vector.broadcast %176 : vector<1x128xf32> to vector<64x128xf32>
    %178 = arith.addf %175, %177 : vector<64x128xf32>
    %179 = arith.addf %178, %146 : vector<64x128xf32>
    %180 = arith.addf %179, %145 : vector<64x128xf32>
    %181 = vector.shape_cast %180 : vector<64x128xf32> to vector<8x8x128xf32>
    %c0_83 = arith.constant 0 : index
    %c0_84 = arith.constant 0 : index
    %c0_85 = arith.constant 0 : index
    %c0_86 = arith.constant 0 : index
    %182 = vector.load %arg19[%c0_83, %c0_84, %c0_85, %c0_86] : memref<1x8x8x128xf32, #tpu.memory_space<vmem>>, vector<1x8x8x128xf32>
    %183 = vector.shape_cast %182 : vector<1x8x8x128xf32> to vector<8x8x128xf32>
    %184 = vector.shape_cast %181 : vector<8x8x128xf32> to vector<1x8x8x128xf32>
    tpu.vector_store %arg19[%c0_83, %c0_84, %c0_85, %c0_86], %184 {strides = array<i32>} : memref<1x8x8x128xf32, #tpu.memory_space<vmem>>, vector<1x8x8x128xf32>,
    return
  }
  func.func @transform_0(%arg0: i32, %arg1: i32) -> (i32, i32, i32, i32, i32) {
    %c0_i32 = arith.constant 0 : i32
    %c0_i32_0 = arith.constant 0 : i32
    %c0_i32_1 = arith.constant 0 : i32
    %c0_i32_2 = arith.constant 0 : i32
    return %arg0, %arg1, %c0_i32, %c0_i32_0, %c0_i32_1 : i32, i32, i32, i32, i32
  }
  func.func @transform_1(%arg0: i32, %arg1: i32) -> (i32, i32, i32, i32, i32) {
    %c8_i32 = arith.constant 8 : i32
    %0 = arith.muli %arg1, %c8_i32 : i32
    %c1_i32 = arith.constant 1 : i32
    %1 = arith.subi %0, %c1_i32 : i32
    %c0_i32 = arith.constant 0 : i32
    %2 = arith.maxsi %1, %c0_i32 : i32
    %c0_i32_0 = arith.constant 0 : i32
    %c0_i32_1 = arith.constant 0 : i32
    %c0_i32_2 = arith.constant 0 : i32
    %c0_i32_3 = arith.constant 0 : i32
    return %arg0, %2, %c0_i32_0, %c0_i32_1, %c0_i32_2 : i32, i32, i32, i32, i32
  }
  func.func @transform_2(%arg0: i32, %arg1: i32) -> (i32, i32, i32, i32, i32) {
    %c1_i32 = arith.constant 1 : i32
    %0 = arith.addi %arg1, %c1_i32 : i32
    %c8_i32 = arith.constant 8 : i32
    %1 = arith.muli %0, %c8_i32 : i32
    %c7_i32 = arith.constant 7 : i32
    %2 = arith.minsi %1, %c7_i32 : i32
    %c0_i32 = arith.constant 0 : i32
    %c0_i32_0 = arith.constant 0 : i32
    %c0_i32_1 = arith.constant 0 : i32
    %c0_i32_2 = arith.constant 0 : i32
    return %arg0, %2, %c0_i32, %c0_i32_0, %c0_i32_1 : i32, i32, i32, i32, i32
  }
  func.func @transform_3(%arg0: i32, %arg1: i32) -> (i32, i32, i32) {
    %c0_i32 = arith.constant 0 : i32
    %c0_i32_0 = arith.constant 0 : i32
    %c0_i32_1 = arith.constant 0 : i32
    %c0_i32_2 = arith.constant 0 : i32
    return %c0_i32, %c0_i32_0, %c0_i32_1 : i32, i32, i32
  }
  func.func @transform_4(%arg0: i32, %arg1: i32) -> (i32, i32) {
    %c0_i32 = arith.constant 0 : i32
    %c0_i32_0 = arith.constant 0 : i32
    %c0_i32_1 = arith.constant 0 : i32
    return %c0_i32, %c0_i32_0 : i32, i32
  }
  func.func @transform_5(%arg0: i32, %arg1: i32) -> (i32, i32) {
    %c0_i32 = arith.constant 0 : i32
    %c0_i32_0 = arith.constant 0 : i32
    %c0_i32_1 = arith.constant 0 : i32
    return %c0_i32, %c0_i32_0 : i32, i32
  }
  func.func @transform_6(%arg0: i32, %arg1: i32) -> (i32, i32) {
    %c0_i32 = arith.constant 0 : i32
    %c0_i32_0 = arith.constant 0 : i32
    %c0_i32_1 = arith.constant 0 : i32
    return %c0_i32, %c0_i32_0 : i32, i32
  }
  func.func @transform_7(%arg0: i32, %arg1: i32) -> (i32, i32, i32) {
    %c0_i32 = arith.constant 0 : i32
    %c0_i32_0 = arith.constant 0 : i32
    %c0_i32_1 = arith.constant 0 : i32
    %c0_i32_2 = arith.constant 0 : i32
    return %c0_i32, %c0_i32_0, %c0_i32_1 : i32, i32, i32
  }
  func.func @transform_8(%arg0: i32, %arg1: i32) -> (i32, i32) {
    %c0_i32 = arith.constant 0 : i32
    %c0_i32_0 = arith.constant 0 : i32
    %c0_i32_1 = arith.constant 0 : i32
    return %c0_i32, %c0_i32_0 : i32, i32
  }
  func.func @transform_9(%arg0: i32, %arg1: i32) -> (i32, i32) {
    %c0_i32 = arith.constant 0 : i32
    %c0_i32_0 = arith.constant 0 : i32
    %c0_i32_1 = arith.constant 0 : i32
    return %c0_i32, %c0_i32_0 : i32, i32
  }
  func.func @transform_10(%arg0: i32, %arg1: i32) -> (i32, i32) {
    %c0_i32 = arith.constant 0 : i32
    %c0_i32_0 = arith.constant 0 : i32
    %c0_i32_1 = arith.constant 0 : i32
    return %c0_i32, %c0_i32_0 : i32, i32
  }
  func.func @transform_11(%arg0: i32, %arg1: i32) -> (i32, i32) {
    %c0_i32 = arith.constant 0 : i32
    %c0_i32_0 = arith.constant 0 : i32
    %c0_i32_1 = arith.constant 0 : i32
    return %c0_i32, %c0_i32_0 : i32, i32
  }
  func.func @transform_12(%arg0: i32, %arg1: i32) -> (i32, i32) {
    %c0_i32 = arith.constant 0 : i32
    %c0_i32_0 = arith.constant 0 : i32
    %c0_i32_1 = arith.constant 0 : i32
    return %c0_i32, %c0_i32_0 : i32, i32
  }
  func.func @transform_13(%arg0: i32, %arg1: i32) -> (i32, i32) {
    %c0_i32 = arith.constant 0 : i32
    %c0_i32_0 = arith.constant 0 : i32
    %c0_i32_1 = arith.constant 0 : i32
    return %c0_i32, %c0_i32_0 : i32, i32
  }
  func.func @transform_14(%arg0: i32, %arg1: i32) -> (i32, i32) {
    %c0_i32 = arith.constant 0 : i32
    %c0_i32_0 = arith.constant 0 : i32
    %c0_i32_1 = arith.constant 0 : i32
    return %c0_i32, %c0_i32_0 : i32, i32
  }
  func.func @transform_15(%arg0: i32, %arg1: i32) -> (i32, i32) {
    %c0_i32 = arith.constant 0 : i32
    %c0_i32_0 = arith.constant 0 : i32
    %c0_i32_1 = arith.constant 0 : i32
    return %c0_i32, %c0_i32_0 : i32, i32
  }
  func.func @transform_16(%arg0: i32, %arg1: i32) -> (i32, i32) {
    %c0_i32 = arith.constant 0 : i32
    %c0_i32_0 = arith.constant 0 : i32
    %c0_i32_1 = arith.constant 0 : i32
    return %c0_i32, %c0_i32_0 : i32, i32
  }
  func.func @transform_17(%arg0: i32, %arg1: i32) -> (i32, i32, i32, i32) {
    %c0_i32 = arith.constant 0 : i32
    %c0_i32_0 = arith.constant 0 : i32
    %c0_i32_1 = arith.constant 0 : i32
    return %arg0, %arg1, %c0_i32, %c0_i32_0 : i32, i32, i32, i32
  }
}

</mosaic_0001>

<bundles_post_ra>
// kernel: resblock_with_stride2_pallas.1
= control target key start
LH: loop header
LB: loop body
LE: loop exit
PB: predicated region body
PF: predicated region fallthrough
CT: control target
= control target key end

     0   :  { %s3068_s24 = smov 0   ;;  %s3070_s25 = smov 0   ;;  %s3940_s0 = inlined_call_operand.vmem [shape: bf16[2,8,2,8,8], index: 0, kind: input, shape index: {}, may-alias: {0,1,2}]   ;;  %s3941_s1 = inlined_call_operand.vmem [shape: bf16[2,8,2,8,8], index: 1, kind: input, shape index: {}, may-alias: {0,1,2}]   ;;  %s3942_s2 = inlined_call_operand.vmem [shape: bf16[2,8,2,8,8], index: 2, kind: input, shape index: {}, may-alias: {0,1,2}]   ;;  %s3943_s3 = inlined_call_operand.vmem [shape: bf16[2,8,128], index: 3, kind: input, shape index: {}]   ;;  %s3944_s4 = inlined_call_operand.vmem [shape: f32[1,128], index: 4, kind: input, shape index: {}]   ;;  %s3945_s5 = inlined_call_operand.vmem [shape: bf16[128,128], index: 5, kind: input, shape index: {}]   ;;  %s3946_s6 = inlined_call_operand.vmem [shape: f32[1,128], index: 6, kind: input, shape index: {}]   ;;  %s3947_s7 = inlined_call_operand.vmem [shape: f32[9,1,128], index: 7, kind: input, shape index: {}]   ;;  %s3948_s8 = inlined_call_operand.vmem [shape: f32[1,128], index: 8, kind: input, shape index: {}]   ;;  %s3949_s9 = inlined_call_operand.vmem [shape: bf16[128,128], index: 9, kind: input, shape index: {}]   ;;  %s3950_s10 = inlined_call_operand.vmem [shape: f32[1,128], index: 10, kind: input, shape index: {}]   ;;  %s3951_s11 = inlined_call_operand.vmem [shape: bf16[128,256], index: 11, kind: input, shape index: {}]   ;;  %s3952_s12 = inlined_call_operand.vmem [shape: f32[1,256], index: 12, kind: input, shape index: {}]   ;;  %s3953_s13 = inlined_call_operand.vmem [shape: bf16[128,256], index: 13, kind: input, shape index: {}]   ;;  %s3954_s14 = inlined_call_operand.vmem [shape: f32[1,256], index: 14, kind: input, shape index: {}]   ;;  %s3955_s15 = inlined_call_operand.vmem [shape: bf16[256,128], index: 15, kind: input, shape index: {}]   ;;  %s3956_s16 = inlined_call_operand.vmem [shape: f32[1,128], index: 16, kind: input, shape index: {}]   ;;  %s3957_s17 = inlined_call_operand.vmem [shape: f32[2,8,8,128], index: 17, kind: output, shape index: {}]  }
   0x1   :  { %3958 = sst [smem:[#allocation2_spill]] %s3940_s0  ;;  %s3072_s26 = smov 0  }
   0x2   :  { %3959 = sst [smem:[#allocation3_spill]] %s3941_s1 }
   0x3 LB: > { %s39_s27 = sadd.s32 1, %s2971_s25  ;;  %p2339_p0 = scmp.ge.s32.totalorder %s2975_s26, 1  ;;  %s2975_s26 = sphi %s3072_s26, %s27_s26   ;;  %s2971_s25 = sphi %s3070_s25, %s3963_s25   ;;  %s2967_s24 = sphi %s3068_s24, %s3962_s24  }
   0x4   : > { %p41_p1 = scmp.ge.s32.totalorder %s39_s27, 2  ;;  %p573_p2 = scmp.lt.s32.totalorder %s2975_s26, 3 }
   0x6   : > { %s3965_s27 = smov (%p41_p1, %s39_s27), 0  ;;  %p574_p3 = pnand %p2339_p0, %p573_p2 }
   0x7   : > { %p661_p4 = scmp.lt.s32.totalorder (!%p574_p3), %s2967_s24, 1  ;;  %s3960_s20 = sld [smem:[#allocation2_spill]] (!%p574_p3) }
   0x8   : > { %577 = sbr.rel (%p574_p3) target bundleno = 927 (0x39f), region = 88  ;;  %s3961_s28 = sld [smem:[#allocation3_spill]] (!%p574_p3) }
   0xd   : > { %v2348_v0 = vld [vmem:[%s3943_s3 + $0x4] sm:$0xf]  ;;  %vm780_vm0 = vcmask 1043456   ;;  %v736_v1 = vld [vmem:[%s3943_s3] sm:$0xf]  ;;  %s3967_s24 = smov (!%p661_p4, %s2967_s24), 1 }
   0xe   : > { %v782_v2 = vsel %vm780_vm0, %v2348_v0, 0  ;;  %v859_v3 = vsel %vm780_vm0, %v736_v1, 0  ;;  %s3092_s18 = sshll.u32 %s3967_s24, 6  ;;  %vm764_vm1 = vcmask 64512   ;;  %v2687_v28 = vld [vmem:[%s3945_s5 + $0x38] sm:$0xff]  ;;  %v2686_v29 = vld [vmem:[%s3945_s5 + $0x30] sm:$0xff] }
   0xf   : > { %791 = vmatpush.bf16.msra.mxu2 %v782_v2  ;;  %868 = vmatpush.bf16.msra.mxu1 %v859_v3  ;;  %s3098_s21 = scalar_lea.vmem %s3960_s20, %s3092_s18  ;;  %s683_s24 = scalar_lea.vmem %s3961_s28, %s3092_s18  ;;  %v2685_v30 = vld [vmem:[%s3945_s5 + $0x28] sm:$0xff]  ;;  %v2684_v37 = vld [vmem:[%s3945_s5 + $0x20] sm:$0xff]  ;;  %v2683_v38 = vld [vmem:[%s3945_s5 + $0x18] sm:$0xff] }
  0x10   : > { %2745 = vmatpush.bf16.msra.mxu3 %v782_v2  ;;  %v2351_v4 = vld [vmem:[%s683_s24 + $0x4] sm:$0xf]  ;;  %v2376_v6 = vld [vmem:[%s683_s24] sm:$0xf]  ;;  %v2359_v10 = vld [vmem:[%s3098_s21 + $0x1c] sm:$0xf] }
  0x11   : > { %v2671_v5 = vld [vmem:[%s3098_s21] sm:$0xf0]  ;;  %v2670_v8 = vld [vmem:[%s3098_s21 - $0x4] sm:$0xf0]  ;;  %v2355_v13 = vld [vmem:[%s3098_s21 + $0xc] sm:$0xf] }
  0x12   : > { %v2352_v7 = vor.u32 %v2671_v5, %v2351_v4  ;;  %v2377_v9 = vor.u32 %v2670_v8, %v2376_v6  ;;  %v2675_v11 = vld [vmem:[%s3098_s21 + $0x20] sm:$0xf0]  ;;  %v2673_v14 = vld [vmem:[%s3098_s21 + $0x10] sm:$0xf0]  ;;  %v2380_v15 = vld [vmem:[%s3098_s21 + $0x8] sm:$0xf] }
  0x13   : > { %v2360_v12 = vor.u32 %v2675_v11, %v2359_v10  ;;  %v2672_v16 = vld [vmem:[%s3098_s21 + $0xc] sm:$0xf0]  ;;  %v2356_v17 = vor.u32 %v2673_v14, %v2355_v13  ;;  %v2363_v18 = vld [vmem:[%s3098_s21 + $0x2c] sm:$0xf]  ;;  %v2677_v19 = vld [vmem:[%s3098_s21 + $0x30] sm:$0xf0]  ;;  %982 = vmatpush.bf16.msrb.mxu2 %v2687_v28 }
  0x14   : > { %2369 = vmatmul.msk.bf16.vlgmr.msra.gmra.mxu2 %vm764_vm1, %v2352_v7  ;;  %2394 = vmatmul.msk.bf16.vlgmr.msra.gmra.mxu1 %vm764_vm1, %v2377_v9  ;;  %v2381_v20 = vor.u32 %v2672_v16, %v2380_v15  ;;  %v2364_v21 = vor.u32 %v2677_v19, %v2363_v18  ;;  %s2668_s29 = sadd.s32 56, %s3092_s18  ;;  %v2384_v22 = vld [vmem:[%s3098_s21 + $0x18] sm:$0xf]  ;;  %v2674_v23 = vld [vmem:[%s3098_s21 + $0x1c] sm:$0xf0]  ;;  %v2682_v39 = vld [vmem:[%s3945_s5 + $0x10] sm:$0xff] }
  0x15   : > { %2371 = vmatmul.msk.bf16.vlgmr.msra.gmra.mxu3 %vm764_vm1, %v2360_v12  ;;  %s700_s19 = scalar_lea.vmem %s3942_s2, %s2668_s29  ;;  %v2367_v24 = vld [vmem:[%s3098_s21 + $0x3c] sm:$0xf]  ;;  %v2385_v26 = vor.u32 %v2674_v23, %v2384_v22  ;;  %v2388_v31 = vld [vmem:[%s3098_s21 + $0x28] sm:$0xf]  ;;  %v2676_v32 = vld [vmem:[%s3098_s21 + $0x2c] sm:$0xf0]  ;;  %s3906_s29 = scalar_lea.vmem %s3957_s17, %s3092_s18 }
  0x16   : > { %v2679_v25 = vld [vmem:[%s700_s19] sm:$0xf0]  ;;  %v2389_v33 = vor.u32 %v2676_v32, %v2388_v31  ;;  %v2392_v34 = vld [vmem:[%s3098_s21 + $0x38] sm:$0xf]  ;;  %v2678_v35 = vld [vmem:[%s700_s19 - $0x4] sm:$0xf0]  ;;  %v1092_v32 = vlaneseq }
  0x17   : > { %v2368_v27 = vor.u32 %v2679_v25, %v2367_v24  ;;  %983 = vmatpush.bf16.msrb.mxu2 %v2686_v29  ;;  %v2393_v36 = vor.u32 %v2678_v35, %v2392_v34  ;;  %v2681_v40 = vld [vmem:[%s3945_s5 + $0x8] sm:$0xff]  ;;  %v2680_v41 = vld [vmem:[%s3945_s5] sm:$0xff]  ;;  %v2695_v25 = vld [vmem:[%s3949_s9 + $0x38] sm:$0xff] }
  0x18   : > { %v2779_v46 = vld [vmem:[%s3944_s4] ss:$0 sm:$0xff]  ;;  %1412 = vmatpush.bf16.msrb.mxu3 %v2695_v25  ;;  %v2693_v29 = vld [vmem:[%s3949_s9 + $0x28] sm:$0xff]  ;;  %v3203_v35 = vshrl.u32 %v1092_v32, 7  ;;  %v3277_v32 = vld [vmem:[%s3947_s7 + $0x5] ss:$0 sm:$0xff] }
  0x19   : > { %v2692_v34 = vld [vmem:[%s3949_s9 + $0x20] sm:$0xff] }
  0x1a   : > { %vm1094_vm2 = vcmp.gt.s32.totalorder %v3203_v35, 0  ;;  %vm1117_vm3 = vcmp.lt.s32.totalorder %v3203_v35, 7 }
  0x1b   : > { %984 = vmatpush.bf16.msrb.mxu2 %v2685_v30 }
  0x1f   : > { %985 = vmatpush.bf16.msrb.mxu2 %v2684_v37 }
  0x23   : > { %986 = vmatpush.bf16.msrb.mxu2 %v2683_v38  ;;  %v2691_v38 = vld [vmem:[%s3949_s9 + $0x18] sm:$0xff] }
  0x24   : > { %2370 = vmatmul.msk.bf16.gmra.mxu2 %vm764_vm1, %v2356_v17  ;;  %2395 = vmatmul.msk.bf16.gmra.mxu1 %vm764_vm1, %v2381_v20 }
  0x25   : > { %2372 = vmatmul.msk.bf16.gmra.mxu3 %vm764_vm1, %v2364_v21 }
  0x27   : > { %987 = vmatpush.bf16.msrb.mxu2 %v2682_v39  ;;  %v2977_v39 = vmov 0.0  }
  0x2b   : > { %988 = vmatpush.bf16.msrb.mxu2 %v2681_v40  ;;  %v1095_v40 = vrot.slane %v2977_v39, 7 }
  0x2f   : > { %989 = vmatpush.bf16.msrb.mxu2 %v2680_v41 }
  0x34   : > { %2396 = vmatmul.msk.bf16.gmra.mxu1 %vm764_vm1, %v2385_v26  ;;  %v2694_v26 = vld [vmem:[%s3949_s9 + $0x30] sm:$0xff] }
  0x35   : > { %2373 = vmatmul.msk.bf16.gmra.mxu3 %vm764_vm1, %v2368_v27  ;;  %v3194_v27 = vld [vmem:[%s3946_s6] ss:$0 sm:$0xff] }
  0x36   : > { %1413 = vmatpush.bf16.msrb.mxu3 %v2694_v26 }
  0x3a   : > { %1414 = vmatpush.bf16.msrb.mxu3 %v2693_v29 }
  0x3e   : > { %1415 = vmatpush.bf16.msrb.mxu3 %v2692_v34 }
  0x42   : > { %1416 = vmatpush.bf16.msrb.mxu3 %v2691_v38 }
  0x44   : > { %2397 = vmatmul.msk.bf16.gmra.mxu1 %vm764_vm1, %v2389_v33 }
  0x54   : > { %2398 = vmatmul.msk.bf16.gmra.mxu1 %vm764_vm1, %v2393_v36 }
  0x91   : > { %v870_v42 = vpop.f32.mrf.mxu1 }
  0x97   : > { %v793_v43 = vpop.f32.mrf.mxu2 }
  0x98   : > { %v871_v45 = vadd.f32 %v870_v42, %v793_v43  ;;  %v803_v54 = vpop.f32.mrf.mxu3 }
  0x99   : > { %v872_v44 = vpop.f32.mrf.mxu1 }
  0x9a   : > { %v899_v49 = vadd.f32 %v2779_v46, %v871_v45 }
  0x9f   : > { %v795_v47 = vpop.f32.mrf.mxu2 }
  0xa0   : > { %v873_v48 = vadd.f32 %v872_v44, %v795_v47  ;;  %v805_v62 = vpop.f32.mrf.mxu3  ;;  %v2690_v44 = vld [vmem:[%s3949_s9 + $0x10] sm:$0xff]  ;;  %v3221_v47 = vld [vmem:[%s3947_s7 + $0x1] ss:$0 sm:$0xff] }
  0xa1   : > { %v875_v51 = vpop.f32.mrf.mxu1  ;;  %1417 = vmatpush.bf16.msrb.mxu3 %v2690_v44 }
  0xa2   : > { %v3161_v50 = vadd.f32 %v2779_v46, %v873_v48  ;;  %v3225_v48 = vsel %vm1094_vm2, %v1095_v40, 0.0 }
  0xa4   : > { %v909_v52 = vpack.c.bf16 %v3161_v50, %v899_v49  ;;  %v1118_v49 = vrot.slane %v2977_v39, 1 }
  0xa6   : > { %990 = vmatmul.bf16.vlgmr.msrb.gmra.mxu2 %v909_v52 }
  0xa7   : > { %v798_v53 = vpop.f32.mrf.mxu2 }
  0xa8   : > { %v876_v56 = vadd.f32 %v875_v51, %v798_v53  ;;  %v808_v2 = vpop.f32.mrf.mxu3  ;;  %v2689_v53 = vld [vmem:[%s3949_s9 + $0x8] sm:$0xff] }
  0xa9   : > { %v877_v55 = vpop.f32.mrf.mxu1  ;;  %1418 = vmatpush.bf16.msrb.mxu3 %v2689_v53 }
  0xaa   : > { %v3164_v59 = vadd.f32 %v2779_v46, %v876_v56  ;;  %v3240_v56 = vld [vmem:[%s3947_s7 + $0x2] ss:$0 sm:$0xff] }
  0xaf   : > { %v800_v57 = vpop.f32.mrf.mxu2 }
  0xb0   : > { %v878_v58 = vadd.f32 %v877_v55, %v800_v57  ;;  %v810_v8 = vpop.f32.mrf.mxu3  ;;  %v1165_v55 = vmul.f32 0.0, %v3221_v47  ;;  %v3244_v57 = vsel %vm1117_vm3, %v1118_v49, 0.0 }
  0xb1   : > { %v880_v61 = vpop.f32.mrf.mxu1 }
  0xb2   : > { %v3166_v60 = vadd.f32 %v2779_v46, %v878_v58  ;;  %v881_v3 = vadd.f32 %v880_v61, %v803_v54 }
  0xb4   : > { %v910_v63 = vpack.c.bf16 %v3166_v60, %v3164_v59  ;;  %v3172_v5 = vadd.f32 %v2779_v46, %v881_v3 }
  0xb6   : > { %995 = vmatmul.bf16.gmra.mxu2 %v910_v63  ;;  %v2688_v63 = vld [vmem:[%s3949_s9] sm:$0xff] }
  0xb7   : > { %1419 = vmatpush.bf16.msrb.mxu3 %v2688_v63 }
  0xb8   : > { %v813_v12 = vpop.f32.mrf.mxu3 }
  0xb9   : > { %v882_v0 = vpop.f32.mrf.mxu1 }
  0xba   : > { %v883_v1 = vadd.f32 %v882_v0, %v805_v62 }
  0xbc   : > { %v3170_v4 = vadd.f32 %v2779_v46, %v883_v1 }
  0xbe   : > { %v911_v7 = vpack.c.bf16 %v3170_v4, %v3172_v5 }
  0xc0   : > { %v815_v17 = vpop.f32.mrf.mxu3 }
  0xc1   : > { %v885_v6 = vpop.f32.mrf.mxu1 }
  0xc2   : > { %v886_v11 = vadd.f32 %v885_v6, %v808_v2  ;;  %v1186_v2 = vmul.f32 %v3240_v56, %v3244_v57 }
  0xc4   : > { %v3178_v14 = vadd.f32 %v2779_v46, %v886_v11 }
  0xc6   : > { %1000 = vmatmul.bf16.gmra.mxu2 %v911_v7  ;;  %v3255_v7 = vld [vmem:[%s3947_s7 + $0x3] ss:$0 sm:$0xff] }
  0xc9   : > { %v887_v9 = vpop.f32.mrf.mxu1 }
  0xca   : > { %v888_v10 = vadd.f32 %v887_v9, %v810_v8 }
  0xcc   : > { %v3176_v13 = vadd.f32 %v2779_v46, %v888_v10 }
  0xce   : > { %v912_v16 = vpack.c.bf16 %v3176_v13, %v3178_v14 }
  0xd1   : > { %v890_v15 = vpop.f32.mrf.mxu1 }
  0xd2   : > { %v891_v19 = vadd.f32 %v890_v15, %v813_v12 }
  0xd4   : > { %v3182_v21 = vadd.f32 %v2779_v46, %v891_v19 }
  0xd6   : > { %1005 = vmatmul.bf16.gmra.mxu2 %v912_v16 }
  0xd9   : > { %v892_v18 = vpop.f32.mrf.mxu1 }
  0xda   : > { %v893_v20 = vadd.f32 %v892_v18, %v815_v17  ;;  %v3267_v18 = vld [vmem:[%s3947_s7 + $0x4] ss:$0 sm:$0xff] }
  0xdc   : > { %v908_v22 = vadd.f32 %v2779_v46, %v893_v20  ;;  %v3216_v46 = vld [vmem:[%s3947_s7] ss:$0 sm:$0xff] }
  0xdd   : > { %v1144_v54 = vmul.f32 %v3216_v46, %v3225_v48 }
  0xde   : > { %v913_v23 = vpack.c.bf16 %v908_v22, %v3182_v21 }
  0xdf   : > { %v1173_v1 = vadd.f32 %v1165_v55, %v1144_v54 }
  0xe1   : > { %v1194_v10 = vadd.f32 %v1186_v2, %v1173_v1 }
  0xe6   : > { %1010 = vmatmul.bf16.gmra.mxu2 %v913_v23 }
 0x129   : > { %v991_v24 = vpop.f32.mrf.mxu2 }
 0x131   : > { %v993_v28 = vpop.f32.mrf.mxu2 }
 0x132   : > { %v994_v30 = vadd.f32 %v3194_v27, %v993_v28 }
 0x134   : > { %v1017_v31 = vmul.f32 -4.0, %v994_v30 }
 0x136   : > { %v1028_v33 = vmul.f32 1.442695, %v1017_v31 }
 0x138   : > { %2793 = vpow2.f32 %v1028_v33 }
 0x139   : > { %v996_v36 = vpop.f32.mrf.mxu2 }
 0x13a   : > { %v997_v37 = vadd.f32 %v3194_v27, %v996_v36  ;;  %v3282_v36 = vld [vmem:[%s3947_s7 + $0x6] ss:$0 sm:$0xff] }
 0x13c   : > { %v1018_v41 = vmul.f32 -4.0, %v997_v37 }
 0x13e   : > { %v2794_v42 = vpop.eup %2793  ;;  %v1030_v43 = vmul.f32 1.442695, %v1018_v41 }
 0x13f   : > { %v1047_v45 = vadd.f32 1.0, %v2794_v42 }
 0x140   : > { %2795 = vpow2.f32 %v1030_v43 }
 0x141   : > { %2797 = vrcp.f32 %v1047_v45  ;;  %v998_v51 = vpop.f32.mrf.mxu2 }
 0x142   : > { %v3229_v52 = vadd.f32 %v3194_v27, %v998_v51 }
 0x144   : > { %v1019_v58 = vmul.f32 -4.0, %v3229_v52 }
 0x146   : > { %v2796_v61 = vpop.eup %2795  ;;  %v1032_v62 = vmul.f32 1.442695, %v1019_v58 }
 0x147   : > { %v2798_v0 = vpop.eup %2797  ;;  %v1048_v3 = vadd.f32 1.0, %v2796_v61  ;;  %v3298_v61 = vld [vmem:[%s3947_s7 + $0x7] ss:$0 sm:$0xff] }
 0x148   : > { %v1067_v6 = vmul.f32 %v2798_v0, %v994_v30  ;;  %2799 = vpow2.f32 %v1032_v62 }
 0x149   : > { %2801 = vrcp.f32 %v1048_v3  ;;  %v1001_v8 = vpop.f32.mrf.mxu2 }
 0x14a   : > { %v1096_v9 = vrot.slane %v1067_v6, 7  ;;  %v3258_v11 = vadd.f32 %v3194_v27, %v1001_v8  ;;  %v1119_v15 = vrot.slane %v1067_v6, 1  ;;  %v1166_v23 = vmul.f32 %v3221_v47, %v1067_v6 }
 0x14b   : > { %v1228_v31 = vmul.f32 %v3267_v18, %v1067_v6 }
 0x14c   : > { %v1108_v12 = vsel %vm1094_vm2, %v1096_v9, 0.0  ;;  %v1020_v20 = vmul.f32 -4.0, %v3258_v11  ;;  %v1131_v26 = vsel %vm1117_vm3, %v1119_v15, 0.0 }
 0x14d   : > { %v1145_v16 = vmul.f32 %v3216_v46, %v1108_v12  ;;  %v1207_v17 = vmul.f32 %v3255_v7, %v1108_v12  ;;  %v1249_v43 = vmul.f32 %v3277_v32, %v1131_v26 }
 0x14e   : > { %v2800_v19 = vpop.eup %2799  ;;  %v1034_v29 = vmul.f32 1.442695, %v1020_v20 }
 0x14f   : > { %v2802_v22 = vpop.eup %2801  ;;  %v1215_v24 = vadd.f32 %v1207_v17, %v1194_v10  ;;  %v1049_v25 = vadd.f32 1.0, %v2800_v19  ;;  %v1174_v30 = vadd.f32 %v1166_v23, %v1145_v16  ;;  %v3313_v17 = vld [vmem:[%s3947_s7 + $0x8] ss:$0 sm:$0xff] }
 0x150   : > { %v1068_v28 = vmul.f32 %v2802_v22, %v997_v37  ;;  %v1187_v37 = vmul.f32 %v3240_v56, %v1131_v26 }
 0x151   : > { %2803 = vrcp.f32 %v1049_v25  ;;  %v1003_v33 = vpop.f32.mrf.mxu2  ;;  %v1236_v38 = vadd.f32 %v1228_v31, %v1215_v24 }
 0x152   : > { %v1097_v34 = vrot.slane %v1068_v28, 7  ;;  %2805 = vpow2.f32 %v1034_v29  ;;  %v3286_v39 = vadd.f32 %v3194_v27, %v1003_v33  ;;  %v1120_v41 = vrot.slane %v1068_v28, 1 }
 0x153   : > { %v1195_v42 = vadd.f32 %v1187_v37, %v1174_v30  ;;  %v1229_v53 = vmul.f32 %v3267_v18, %v1068_v28  ;;  %v1257_v58 = vadd.f32 %v1249_v43, %v1236_v38  ;;  %v1167_v9 = vmul.f32 %v3221_v47, %v1068_v28 }
 0x154   : > { %v1109_v40 = vsel %vm1094_vm2, %v1097_v34, 0.0  ;;  %v1021_v44 = vmul.f32 -4.0, %v3286_v39  ;;  %v1132_v0 = vsel %vm1117_vm3, %v1120_v41, 0.0  ;;  %v1291_v16 = vmul.f32 %v3298_v61, %v1068_v28 }
 0x155   : > { %v1208_v45 = vmul.f32 %v3255_v7, %v1109_v40  ;;  %v1270_v49 = vmul.f32 %v3282_v36, %v1109_v40  ;;  %v1146_v1 = vmul.f32 %v3216_v46, %v1109_v40  ;;  %v1188_v28 = vmul.f32 %v3240_v56, %v1132_v0 }
 0x156   : > { %v1036_v54 = vmul.f32 1.442695, %v1021_v44  ;;  %v1312_v37 = vmul.f32 %v3313_v17, %v1132_v0 }
 0x157   : > { %v2804_v51 = vpop.eup %2803  ;;  %v1216_v55 = vadd.f32 %v1208_v45, %v1195_v42  ;;  %v1278_v8 = vadd.f32 %v1270_v49, %v1257_v58  ;;  %v1175_v22 = vadd.f32 %v1167_v9, %v1146_v1 }
 0x158   : > { %v2806_v62 = vpop.eup %2805  ;;  %v1069_v63 = vmul.f32 %v2804_v51, %v3229_v52  ;;  %2807 = vpow2.f32 %v1036_v54  ;;  %v1250_v52 = vmul.f32 %v3277_v32, %v1132_v0 }
 0x159   : > { %v1050_v2 = vadd.f32 1.0, %v2806_v62  ;;  %v1006_v3 = vpop.f32.mrf.mxu2  ;;  %v1237_v6 = vadd.f32 %v1229_v53, %v1216_v55  ;;  %v1299_v25 = vadd.f32 %v1291_v16, %v1278_v8  ;;  %v1196_v41 = vadd.f32 %v1188_v28, %v1175_v22  ;;  %v3331_v53 = vld [vmem:[%s3948_s8] ss:$0 sm:$0xff] }
 0x15a   : > { %v1098_v10 = vrot.slane %v1069_v63, 7  ;;  %v3306_v12 = vadd.f32 %v3194_v27, %v1006_v3  ;;  %v1121_v15 = vrot.slane %v1069_v63, 1  ;;  %v1292_v34 = vmul.f32 %v3298_v61, %v1069_v63 }
 0x15b   : > { %2809 = vrcp.f32 %v1050_v2  ;;  %v1258_v23 = vadd.f32 %v1250_v52, %v1237_v6  ;;  %v1168_v43 = vmul.f32 %v3221_v47, %v1069_v63  ;;  %v1320_v51 = vadd.f32 %v1312_v37, %v1299_v25 }
 0x15c   : > { %v1022_v19 = vmul.f32 -4.0, %v3306_v12  ;;  %v1110_v20 = vsel %vm1094_vm2, %v1098_v10, 0.0  ;;  %v1133_v29 = vsel %vm1117_vm3, %v1121_v15, 0.0  ;;  %v1230_v0 = vmul.f32 %v3267_v18, %v1069_v63 }
 0x15d   : > { %v1271_v24 = vmul.f32 %v3282_v36, %v1110_v20  ;;  %v1209_v30 = vmul.f32 %v3255_v7, %v1110_v20  ;;  %v1147_v40 = vmul.f32 %v3216_v46, %v1110_v20  ;;  %v1313_v49 = vmul.f32 %v3313_v17, %v1133_v29 }
 0x15e   : > { %v1038_v26 = vmul.f32 1.442695, %v1022_v19  ;;  %v2808_v31 = vpop.eup %2807  ;;  %v1332_v6 = vadd.f32 %v3331_v53, %v1320_v51  ;;  %v1251_v22 = vmul.f32 %v3277_v32, %v1133_v29 }
 0x15f   : > { %v1279_v33 = vadd.f32 %v1271_v24, %v1258_v23  ;;  %v1051_v38 = vadd.f32 1.0, %v2808_v31  ;;  %v1217_v58 = vadd.f32 %v1209_v30, %v1196_v41  ;;  %v1176_v3 = vadd.f32 %v1168_v43, %v1147_v40 }
 0x160   : > { %2811 = vpow2.f32 %v1038_v26 }
 0x161   : > { %v2810_v42 = vpop.eup %2809  ;;  %v1008_v44 = vpop.f32.mrf.mxu2  ;;  %v1300_v45 = vadd.f32 %v1292_v34, %v1279_v33  ;;  %2813 = vrcp.f32 %v1051_v38  ;;  %v1238_v16 = vadd.f32 %v1230_v0, %v1217_v58 }
 0x162   : > { %v1070_v54 = vmul.f32 %v2810_v42, %v3258_v11  ;;  %v3335_v55 = vadd.f32 %v3194_v27, %v1008_v44  ;;  %v1189_v11 = vmul.f32 %v3240_v56, %v1133_v29 }
 0x163   : > { %v1321_v62 = vadd.f32 %v1313_v49, %v1300_v45  ;;  %v1259_v38 = vadd.f32 %v1251_v22, %v1238_v16 }
 0x164   : > { %v1099_v1 = vrot.slane %v1070_v54, 7  ;;  %v1023_v2 = vmul.f32 -4.0, %v3335_v55  ;;  %v1122_v9 = vrot.slane %v1070_v54, 1  ;;  %v1197_v24 = vadd.f32 %v1189_v11, %v1176_v3 }
 0x165   : > { %v1333_v8 = vadd.f32 %v3331_v53, %v1321_v62  ;;  %v1169_v28 = vmul.f32 %v3221_v47, %v1070_v54  ;;  %v1231_v34 = vmul.f32 %v3267_v18, %v1070_v54  ;;  %v1293_v43 = vmul.f32 %v3298_v61, %v1070_v54 }
 0x166   : > { %v2812_v10 = vpop.eup %2811  ;;  %v1040_v15 = vmul.f32 1.442695, %v1023_v2  ;;  %v1111_v52 = vsel %vm1094_vm2, %v1099_v1, 0.0  ;;  %v1134_v25 = vsel %vm1117_vm3, %v1122_v9, 0.0 }
 0x167   : > { %v1052_v19 = vadd.f32 1.0, %v2812_v10  ;;  %v1340_v20 = vpack.c.bf16 %v1333_v8, %v1332_v6  ;;  %v1148_v63 = vmul.f32 %v3216_v46, %v1111_v52  ;;  %v2814_v23 = vpop.eup %2813  ;;  %v1210_v26 = vmul.f32 %v3255_v7, %v1111_v52 }
 0x168   : > { %2815 = vpow2.f32 %v1040_v15  ;;  %v1071_v30 = vmul.f32 %v2814_v23, %v3286_v39  ;;  %v1272_v33 = vmul.f32 %v3282_v36, %v1111_v52  ;;  %v1190_v42 = vmul.f32 %v3240_v56, %v1134_v25 }
 0x169   : > { %2817 = vrcp.f32 %v1052_v19  ;;  %v1011_v31 = vpop.f32.mrf.mxu2  ;;  %1420 = vmatmul.bf16.vlgmr.msrb.gmra.mxu3 %v1340_v20  ;;  %v1218_v37 = vadd.f32 %v1210_v26, %v1197_v24  ;;  %v1177_v41 = vadd.f32 %v1169_v28, %v1148_v63  ;;  %v1314_v62 = vmul.f32 %v3313_v17, %v1134_v25 }
 0x16a   : > { %v3354_v29 = vadd.f32 %v3194_v27, %v1011_v31  ;;  %v1100_v40 = vrot.slane %v1071_v30, 7  ;;  %v1123_v44 = vrot.slane %v1071_v30, 1  ;;  %v1280_v49 = vadd.f32 %v1272_v33, %v1259_v38 }
 0x16b   : > { %v1239_v45 = vadd.f32 %v1231_v34, %v1218_v37  ;;  %v1170_v51 = vmul.f32 %v3221_v47, %v1071_v30  ;;  %v1252_v27 = vmul.f32 %v3277_v32, %v1134_v25  ;;  %v1232_v1 = vmul.f32 %v3267_v18, %v1071_v30 }
 0x16c   : > { %v1024_v39 = vmul.f32 -4.0, %v3354_v29  ;;  %v1112_v58 = vsel %vm1094_vm2, %v1100_v40, 0.0  ;;  %v1198_v9 = vadd.f32 %v1190_v42, %v1177_v41  ;;  %v1135_v52 = vsel %vm1117_vm3, %v1123_v44, 0.0 }
 0x16d   : > { %v1149_v54 = vmul.f32 %v3216_v46, %v1112_v58  ;;  %v1211_v3 = vmul.f32 %v3255_v7, %v1112_v58  ;;  %v1260_v10 = vadd.f32 %v1252_v27, %v1239_v45  ;;  %v1273_v15 = vmul.f32 %v3282_v36, %v1112_v58 }
 0x16e   : > { %v2816_v0 = vpop.eup %2815  ;;  %v1042_v2 = vmul.f32 1.442695, %v1024_v39  ;;  %v1301_v16 = vadd.f32 %v1293_v43, %v1280_v49  ;;  %v1294_v63 = vmul.f32 %v3298_v61, %v1071_v30  ;;  %v1315_v26 = vmul.f32 %v3313_v17, %v1135_v52 }
 0x16f   : > { %v2818_v6 = vpop.eup %2817  ;;  %v1053_v8 = vadd.f32 1.0, %v2816_v0  ;;  %v1281_v20 = vadd.f32 %v1273_v15, %v1260_v10  ;;  %v1219_v22 = vadd.f32 %v1211_v3, %v1198_v9  ;;  %v1178_v24 = vadd.f32 %v1170_v51, %v1149_v54 }
 0x170   : > { %v1072_v11 = vmul.f32 %v2818_v6, %v3306_v12  ;;  %2819 = vpow2.f32 %v1042_v2  ;;  %v1322_v28 = vadd.f32 %v1314_v62, %v1301_v16  ;;  %v1191_v12 = vmul.f32 %v3240_v56, %v1135_v52  ;;  %v2593_v16 = vld [vmem:[%s3953_s13 + $0x70] sm:$0xf] }
 0x171   : > { %2821 = vrcp.f32 %v1053_v8  ;;  %v1013_v19 = vpop.f32.mrf.mxu2  ;;  %v1302_v25 = vadd.f32 %v1294_v63, %v1281_v20  ;;  %v1240_v31 = vadd.f32 %v1232_v1, %v1219_v22  ;;  %v1253_v37 = vmul.f32 %v3277_v32, %v1135_v52  ;;  %v2711_v52 = vld [vmem:[%s3951_s11 + $0x74] sm:$0xf0] }
 0x172   : > { %v1101_v23 = vrot.slane %v1072_v11, 7  ;;  %v1124_v34 = vrot.slane %v1072_v11, 1  ;;  %v1199_v41 = vadd.f32 %v1191_v12, %v1178_v24  ;;  %v1334_v30 = vadd.f32 %v3331_v53, %v1322_v28  ;;  %v2727_v22 = vld [vmem:[%s3953_s13 + $0x74] sm:$0xf0]  ;;  %v2595_v28 = vld [vmem:[%s3953_s13 + $0x78] sm:$0xf0] }
 0x173   : > { %v1323_v38 = vadd.f32 %v1315_v26, %v1302_v25  ;;  %v1261_v49 = vadd.f32 %v1253_v37, %v1240_v31  ;;  %v1171_v58 = vmul.f32 %v3221_v47, %v1072_v11  ;;  %v1233_v1 = vmul.f32 %v3267_v18, %v1072_v11  ;;  %v2521_v31 = vld [vmem:[%s3951_s11 + $0x60] sm:$0xf]  ;;  %v2709_v12 = vld [vmem:[%s3951_s11 + $0x64] sm:$0xf0] }
 0x174   : > { %v1113_v33 = vsel %vm1094_vm2, %v1101_v23, 0.0  ;;  %v1136_v62 = vsel %vm1117_vm3, %v1124_v34, 0.0  ;;  %v1295_v9 = vmul.f32 %v3298_v61, %v1072_v11  ;;  %v2726_v23 = vld [vmem:[%s3953_s13 + $0x74] sm:$0xf] }
 0x175   : > { %v1150_v42 = vmul.f32 %v3216_v46, %v1113_v33  ;;  %v1212_v43 = vmul.f32 %v3255_v7, %v1113_v33  ;;  %v1335_v45 = vadd.f32 %v3331_v53, %v1323_v38  ;;  %v1274_v51 = vmul.f32 %v3282_v36, %v1113_v33  ;;  %v2585_v38 = vld [vmem:[%s3953_s13 + $0x60] sm:$0xf] }
 0x176   : > { %v2820_v40 = vpop.eup %2819  ;;  %v1192_v10 = vmul.f32 %v3240_v56, %v1136_v62  ;;  %v1254_v11 = vmul.f32 %v3277_v32, %v1136_v62  ;;  %v1316_v26 = vmul.f32 %v3313_v17, %v1136_v62  ;;  %v2513_v62 = vld [vmem:[%s3951_s11 + $0x50] sm:$0xf] }
 0x177   : > { %v2822_v39 = vpop.eup %2821  ;;  %v1054_v44 = vadd.f32 1.0, %v2820_v40  ;;  %v1220_v0 = vadd.f32 %v1212_v43, %v1199_v41  ;;  %v1341_v2 = vpack.c.bf16 %v1335_v45, %v1334_v30  ;;  %v1282_v54 = vadd.f32 %v1274_v51, %v1261_v49  ;;  %v2725_v40 = vld [vmem:[%s3953_s13 + $0x64] sm:$0xf0] }
 0x178   : > { %v1073_v27 = vmul.f32 %v2822_v39, %v3335_v55  ;;  %v1179_v8 = vadd.f32 %v1171_v58, %v1150_v42  ;;  %v2529_v55 = vld [vmem:[%s3951_s11 + $0x70] sm:$0xf]  ;;  %v2598_v43 = vor.u32 %v2726_v23, %v2595_v28  ;;  %v2724_v39 = vld [vmem:[%s3953_s13 + $0x64] sm:$0xf]  ;;  %v2522_v51 = vor.u32 %v2709_v12, %v2521_v31  ;;  %v2587_v58 = vld [vmem:[%s3953_s13 + $0x68] sm:$0xf0] }
 0x179   : > { %2823 = vrcp.f32 %v1054_v44  ;;  %1425 = vmatmul.bf16.gmra.mxu3 %v1341_v2  ;;  %v1241_v15 = vadd.f32 %v1233_v1, %v1220_v0  ;;  %v1303_v20 = vadd.f32 %v1295_v9, %v1282_v54  ;;  %v2530_v63 = vor.u32 %v2711_v52, %v2529_v55  ;;  %v2707_v0 = vld [vmem:[%s3951_s11 + $0x54] sm:$0xf0]  ;;  %v2577_v54 = vld [vmem:[%s3953_s13 + $0x50] sm:$0xf] }
 0x17a   : > { %v1102_v3 = vrot.slane %v1073_v27, 7  ;;  %v1125_v6 = vrot.slane %v1073_v27, 1  ;;  %v1172_v33 = vmul.f32 %v3221_v47, %v1073_v27  ;;  %v1200_v34 = vadd.f32 %v1192_v10, %v1179_v8  ;;  %1840 = vmatpush.bf16.msra.mxu2 %v2598_v43  ;;  %v2723_v10 = vld [vmem:[%s3953_s13 + $0x54] sm:$0xf0] }
 0x17b   : > { %1555 = vmatpush.bf16.msra.mxu0 %v2530_v63  ;;  %v1296_v42 = vmul.f32 %v3298_v61, %v1073_v27  ;;  %v2594_v47 = vor.u32 %v2727_v22, %v2593_v16  ;;  %v1324_v49 = vadd.f32 %v1316_v26, %v1303_v20  ;;  %v1234_v55 = vmul.f32 %v3267_v18, %v1073_v27  ;;  %v2505_v20 = vld [vmem:[%s3951_s11 + $0x40] sm:$0xf]  ;;  %v2705_v63 = vld [vmem:[%s3951_s11 + $0x44] sm:$0xf0] }
 0x17c   : > { %v1114_v19 = vsel %vm1094_vm2, %v1102_v3, 0.0  ;;  %v1137_v30 = vsel %vm1117_vm3, %v1125_v6, 0.0  ;;  %v2590_v16 = vor.u32 %v2724_v39, %v2587_v58  ;;  %v2578_v26 = vor.u32 %v2723_v10, %v2577_v54 }
 0x17d   : > { %v1151_v24 = vmul.f32 %v3216_v46, %v1114_v19  ;;  %v1213_v25 = vmul.f32 %v3255_v7, %v1114_v19  ;;  %v1262_v46 = vadd.f32 %v1254_v11, %v1241_v15  ;;  %v1275_v37 = vmul.f32 %v3282_v36, %v1114_v19  ;;  %1811 = vmatpush.bf16.msra.mxu3 %v2594_v47  ;;  %v2722_v15 = vld [vmem:[%s3953_s13 + $0x54] sm:$0xf]  ;;  %v2579_v11 = vld [vmem:[%s3953_s13 + $0x58] sm:$0xf0] }
 0x17e   : > { %v1317_v8 = vmul.f32 %v3313_v17, %v1137_v30  ;;  %v1193_v52 = vmul.f32 %v3240_v56, %v1137_v30  ;;  %v2514_v19 = vor.u32 %v2707_v0, %v2513_v62  ;;  %v1336_v23 = vadd.f32 %v3331_v53, %v1324_v49  ;;  %1841 = vmatpush.bf16.msra.mxu2 %v2590_v16  ;;  %v2553_v16 = vld [vmem:[%s3953_s13 + $0x20] sm:$0xf] }
 0x17f   : > { %v2824_v41 = vpop.eup %2823  ;;  %v1283_v45 = vadd.f32 %v1275_v37, %v1262_v46  ;;  %v1180_v1 = vadd.f32 %v1172_v33, %v1151_v24  ;;  %v1221_v2 = vadd.f32 %v1213_v25, %v1200_v34  ;;  %1556 = vmatpush.bf16.msra.mxu0 %v2522_v51  ;;  %v2582_v12 = vor.u32 %v2722_v15, %v2579_v11  ;;  %v2569_v34 = vld [vmem:[%s3953_s13 + $0x40] sm:$0xf]  ;;  %v2717_v11 = vld [vmem:[%s3953_s13 + $0x24] sm:$0xf0] }
 0x180   : > { %v3434_v44 = vmul.f32 %v2824_v41, %v3354_v29  ;;  %v2586_v29 = vor.u32 %v2725_v40, %v2585_v38  ;;  %v2506_v33 = vor.u32 %v2705_v63, %v2505_v20  ;;  %v1255_v37 = vmul.f32 %v3277_v32, %v1137_v30  ;;  %v2720_v40 = vld [vmem:[%s3953_s13 + $0x44] sm:$0xf]  ;;  %v2571_v41 = vld [vmem:[%s3953_s13 + $0x48] sm:$0xf0] }
 0x181   : > { %v1304_v6 = vadd.f32 %v1296_v42, %v1283_v45  ;;  %v1201_v27 = vadd.f32 %v1193_v52, %v1180_v1  ;;  %v1242_v25 = vadd.f32 %v1234_v55, %v1221_v2  ;;  %v1277_v47 = vmul.f32 %v3282_v36, %v3225_v48  ;;  %v2489_v55 = vld [vmem:[%s3951_s11 + $0x20] sm:$0xf]  ;;  %v2701_v52 = vld [vmem:[%s3951_s11 + $0x24] sm:$0xf0]  ;;  %v2716_v20 = vld [vmem:[%s3953_s13 + $0x24] sm:$0xf] }
 0x182   : > { %v1103_v3 = vrot.slane %v3434_v44, 7  ;;  %v1126_v9 = vrot.slane %v3434_v44, 1  ;;  %1812 = vmatpush.bf16.msra.mxu3 %v2586_v29  ;;  %v1235_v46 = vmul.f32 %v3267_v18, %v3434_v44  ;;  %1842 = vmatpush.bf16.msra.mxu2 %v2582_v12  ;;  %v2574_v45 = vor.u32 %v2720_v40, %v2571_v41  ;;  %v2555_v63 = vld [vmem:[%s3953_s13 + $0x28] sm:$0xf0] }
 0x183   : > { %v1325_v22 = vadd.f32 %v1317_v8, %v1304_v6  ;;  %1557 = vmatpush.bf16.msra.mxu0 %v2514_v19  ;;  %v1263_v39 = vadd.f32 %v1255_v37, %v1242_v25  ;;  %v1298_v58 = vmul.f32 0.0, %v3298_v61  ;;  %v1297_v0 = vmul.f32 %v3298_v61, %v3434_v44  ;;  %v2497_v61 = vld [vmem:[%s3951_s11 + $0x30] sm:$0xf]  ;;  %v2719_v8 = vld [vmem:[%s3953_s13 + $0x34] sm:$0xf0] }
 0x184   : > { %v1115_v56 = vsel %vm1094_vm2, %v1103_v3, 0.0  ;;  %v1138_v31 = vsel %vm1117_vm3, %v1126_v9, 0.0  ;;  %v1319_v48 = vmul.f32 %v3313_v17, %v3244_v57  ;;  %v2703_v57 = vld [vmem:[%s3951_s11 + $0x34] sm:$0xf0]  ;;  %v2563_v9 = vld [vmem:[%s3953_s13 + $0x38] sm:$0xf0]  ;;  %v2490_v19 = vor.u32 %v2701_v52, %v2489_v55 }
 0x185   : > { %v1214_v24 = vmul.f32 %v3255_v7, %v1115_v56  ;;  %v1337_v28 = vadd.f32 %v3331_v53, %v1325_v22  ;;  %v2721_v7 = vld [vmem:[%s3953_s13 + $0x44] sm:$0xf0]  ;;  %v1276_v35 = vmul.f32 %v3282_v36, %v1115_v56  ;;  %v1256_v18 = vmul.f32 %v3277_v32, %v1138_v31  ;;  %v2481_v56 = vld [vmem:[%s3951_s11 + $0x10] sm:$0xf]  ;;  %v2539_v40 = vld [vmem:[%s3953_s13 + $0x8] sm:$0xf0] }
 0x186   : > { %1813 = vmatpush.bf16.msra.mxu3 %v2578_v26  ;;  %v2570_v30 = vor.u32 %v2721_v7, %v2569_v34  ;;  %1843 = vmatpush.bf16.msra.mxu2 %v2574_v45  ;;  %v1318_v1 = vmul.f32 %v3313_v17, %v1138_v31  ;;  %v2561_v17 = vld [vmem:[%s3953_s13 + $0x30] sm:$0xf]  ;;  %v2498_v44 = vor.u32 %v2703_v57, %v2497_v61  ;;  %v2715_v26 = vld [vmem:[%s3953_s13 + $0x14] sm:$0xf0]  ;;  %v2547_v31 = vld [vmem:[%s3953_s13 + $0x18] sm:$0xf0] }
 0x187   : > { %v1222_v38 = vadd.f32 %v1214_v24, %v1201_v27  ;;  %v1342_v42 = vpack.c.bf16 %v1337_v28, %v1336_v23  ;;  %1558 = vmatpush.bf16.msra.mxu0 %v2506_v33  ;;  %v1284_v51 = vadd.f32 %v1276_v35, %v1263_v39  ;;  %v2562_v10 = vor.u32 %v2719_v8, %v2561_v17  ;;  %v2699_v27 = vld [vmem:[%s3951_s11 + $0x14] sm:$0xf0]  ;;  %v2545_v24 = vld [vmem:[%s3953_s13 + $0x10] sm:$0xf]  ;;  %v2714_v28 = vld [vmem:[%s3953_s13 + $0x14] sm:$0xf] }
 0x188   : > { %v2554_v22 = vor.u32 %v2717_v11, %v2553_v16  ;;  %v2558_v23 = vor.u32 %v2716_v20, %v2555_v63  ;;  %v2482_v25 = vor.u32 %v2699_v27, %v2481_v56  ;;  %v2546_v12 = vor.u32 %v2715_v26, %v2545_v24  ;;  %v2473_v34 = vld [vmem:[%s3951_s11] sm:$0xf]  ;;  %v2697_v7 = vld [vmem:[%s3951_s11 + $0x4] sm:$0xf0]  ;;  %v2712_v35 = vld [vmem:[%s3953_s13 + $0x4] sm:$0xf] }
 0x189   : > { %v1243_v43 = vadd.f32 %v1235_v46, %v1222_v38  ;;  %1430 = vmatmul.bf16.gmra.mxu3 %v1342_v42  ;;  %v1305_v32 = vadd.f32 %v1297_v0, %v1284_v51  ;;  %v2550_v33 = vor.u32 %v2714_v28, %v2547_v31  ;;  %v2537_v46 = vld [vmem:[%s3953_s13] sm:$0xf]  ;;  %v2474_v37 = vor.u32 %v2697_v7, %v2473_v34  ;;  %v2713_v38 = vld [vmem:[%s3953_s13 + $0x4] sm:$0xf0]  ;;  %v2708_v39 = vld [vmem:[%s3951_s11 + $0x64] sm:$0xf] }
 0x18a   : > { %1814 = vmatpush.bf16.msra.mxu3 %v2570_v30  ;;  %v2538_v41 = vor.u32 %v2713_v38, %v2537_v46  ;;  %v2542_v42 = vor.u32 %v2712_v35, %v2539_v40  ;;  %v2523_v30 = vld [vmem:[%s3951_s11 + $0x68] sm:$0xf0]  ;;  %v2515_v51 = vld [vmem:[%s3951_s11 + $0x58] sm:$0xf0]  ;;  %v2696_v55 = vld [vmem:[%s3951_s11 + $0x4] sm:$0xf] }
 0x18b   : > { %v1264_v49 = vadd.f32 %v1256_v18, %v1243_v43  ;;  %v1326_v29 = vadd.f32 %v1318_v1, %v1305_v32  ;;  %1559 = vmatpush.bf16.msra.mxu0 %v2498_v44  ;;  %v2531_v43 = vld [vmem:[%s3951_s11 + $0x78] sm:$0xf0]  ;;  %v2526_v45 = vor.u32 %v2708_v39, %v2523_v30  ;;  %v2507_v0 = vld [vmem:[%s3951_s11 + $0x48] sm:$0xf0]  ;;  %v2702_v1 = vld [vmem:[%s3951_s11 + $0x34] sm:$0xf] }
 0x18c   : > { %v2475_v52 = vld [vmem:[%s3951_s11 + $0x8] sm:$0xf0]  ;;  %v2735_v40 = vld [vmem:[%s3955_s15 + $0x38] sm:$0xff]  ;;  %v1725_v30 = vld [vmem:[%s3954_s14] sm:$0x3] }
 0x18d   : > { %v1285_v62 = vadd.f32 %v1277_v47, %v1264_v49  ;;  %v1338_v3 = vadd.f32 %v3331_v53, %v1326_v29  ;;  %v2710_v47 = vld [vmem:[%s3951_s11 + $0x74] sm:$0xf]  ;;  %v2700_v29 = vld [vmem:[%s3951_s11 + $0x24] sm:$0xf]  ;;  %v2478_v16 = vor.u32 %v2696_v55, %v2475_v52 }
 0x18e   : > { %1815 = vmatpush.bf16.msra.mxu3 %v2562_v10  ;;  %v2534_v18 = vor.u32 %v2710_v47, %v2531_v43  ;;  %v2706_v49 = vld [vmem:[%s3951_s11 + $0x54] sm:$0xf]  ;;  %v2483_v10 = vld [vmem:[%s3951_s11 + $0x18] sm:$0xf0]  ;;  %v2733_v47 = vld [vmem:[%s3955_s15 + $0x28] sm:$0xff] }
 0x18f   : > { %v1306_v36 = vadd.f32 %v1298_v58, %v1285_v62  ;;  %1560 = vmatpush.bf16.msra.mxu0 %v2490_v19  ;;  %v2518_v58 = vor.u32 %v2706_v49, %v2515_v51  ;;  %v2704_v62 = vld [vmem:[%s3951_s11 + $0x44] sm:$0xf]  ;;  %v2731_v49 = vld [vmem:[%s3955_s15 + $0x18] sm:$0xff]  ;;  %v3686_v51 = vperm.slane %v1725_v30, 0 }
 0x190   : > { %2746 = vmatpush.bf16.msrb.mxu1 %v2534_v18  ;;  %v2510_v32 = vor.u32 %v2704_v62, %v2507_v0  ;;  %v2730_v0 = vld [vmem:[%s3955_s15 + $0x10] sm:$0xff] }
 0x191   : > { %v1327_v2 = vadd.f32 %v1319_v48, %v1306_v36  ;;  %v2791_v36 = vld [vmem:[%s3950_s10] ss:$0 sm:$0xff] }
 0x192   : > { %1816 = vmatpush.bf16.msra.mxu3 %v2554_v22 }
 0x193   : > { %v1339_v54 = vadd.f32 %v3331_v53, %v1327_v2  ;;  %v2718_v53 = vld [vmem:[%s3953_s13 + $0x34] sm:$0xf]  ;;  %1561 = vmatpush.bf16.msra.mxu0 %v2482_v25  ;;  %v2499_v2 = vld [vmem:[%s3951_s11 + $0x38] sm:$0xf0] }
 0x194   : > { %v2566_v15 = vor.u32 %v2718_v53, %v2563_v9  ;;  %2747 = vmatpush.bf16.msrb.mxu1 %v2526_v45  ;;  %v2698_v9 = vld [vmem:[%s3951_s11 + $0x14] sm:$0xf] }
 0x195   : > { %v1343_v6 = vpack.c.bf16 %v1339_v54, %v1338_v3  ;;  %v2502_v54 = vor.u32 %v2702_v1, %v2499_v2  ;;  %v2491_v3 = vld [vmem:[%s3951_s11 + $0x28] sm:$0xf0] }
 0x196   : > { %1844 = vmatpush.bf16.msra.mxu2 %v2566_v15  ;;  %1817 = vmatpush.bf16.msra.mxu3 %v2546_v12  ;;  %v2494_v57 = vor.u32 %v2700_v29, %v2491_v3  ;;  %v2486_v15 = vor.u32 %v2698_v9, %v2483_v10 }
 0x197   : > { %1562 = vmatpush.bf16.msra.mxu0 %v2474_v37 }
 0x198   : > { %2748 = vmatpush.bf16.msrb.mxu1 %v2518_v58 }
 0x199   : > { %1435 = vmatmul.bf16.gmra.mxu3 %v1343_v6 }
 0x19a   : > { %1845 = vmatpush.bf16.msra.mxu2 %v2558_v23  ;;  %1818 = vmatpush.bf16.msra.mxu3 %v2538_v41  ;;  %v2734_v41 = vld [vmem:[%s3955_s15 + $0x30] sm:$0xff] }
 0x19b   : > { %1584 = vmatpush.bf16.msrb.mxu0 %v2534_v18  ;;  %v2732_v18 = vld [vmem:[%s3955_s15 + $0x20] sm:$0xff] }
 0x19c   : > { %2749 = vmatpush.bf16.msrb.mxu1 %v2510_v32 }
 0x19e   : > { %1846 = vmatpush.bf16.msra.mxu2 %v2550_v33 }
 0x19f   : > { %1585 = vmatpush.bf16.msrb.mxu0 %v2526_v45 }
 0x1a0   : > { %2750 = vmatpush.bf16.msrb.mxu1 %v2502_v54 }
 0x1a2   : > { %1847 = vmatpush.bf16.msra.mxu2 %v2542_v42  ;;  %v3666_v42 = vld [vmem:[%s3952_s12] sm:$0x3] }
 0x1a3   : > { %1586 = vmatpush.bf16.msrb.mxu0 %v2518_v58  ;;  %v3672_v43 = vperm.slane %v3666_v42, 0 }
 0x1a4   : > { %2751 = vmatpush.bf16.msrb.mxu1 %v2494_v57 }
 0x1a7   : > { %1587 = vmatpush.bf16.msrb.mxu0 %v2510_v32 }
 0x1a8   : > { %2752 = vmatpush.bf16.msrb.mxu1 %v2486_v15 }
 0x1ab   : > { %1588 = vmatpush.bf16.msrb.mxu0 %v2502_v54  ;;  %v2729_v54 = vld [vmem:[%s3955_s15 + $0x8] sm:$0xff] }
 0x1ac   : > { %2753 = vmatpush.bf16.msrb.mxu1 %v2478_v16 }
 0x1af   : > { %1589 = vmatpush.bf16.msrb.mxu0 %v2494_v57 }
 0x1b3   : > { %1590 = vmatpush.bf16.msrb.mxu0 %v2486_v15 }
 0x1b7   : > { %1591 = vmatpush.bf16.msrb.mxu0 %v2478_v16 }
 0x1ec   : > { %v1421_v48 = vpop.f32.mrf.mxu3 }
 0x1ed   : > { %v1422_v6 = vadd.f32 %v2791_v36, %v1421_v48 }
 0x1ef   : > { %v3614_v44 = vadd.f32 %v1422_v6, %v3161_v50 }
 0x1f4   : > { %v1423_v61 = vpop.f32.mrf.mxu3 }
 0x1f5   : > { %v1424_v17 = vadd.f32 %v2791_v36, %v1423_v61 }
 0x1f7   : > { %v3617_v8 = vadd.f32 %v1424_v17, %v3164_v59  ;;  %v2728_v17 = vld [vmem:[%s3955_s15] sm:$0xff] }
 0x1f9   : > { %v1449_v53 = vpack.c.bf16 %v3617_v8, %v3614_v44 }
 0x1fb   : > { %1563 = vmatmul.bf16.vlgmr.msra.gmra.mxu0 %v1449_v53  ;;  %1819 = vmatmul.bf16.vlgmr.msra.gmra.mxu3 %v1449_v53 }
 0x1fc   : > { %1848 = vmatmul.bf16.vlgmr.msra.gmra.mxu2 %v1449_v53  ;;  %v1426_v19 = vpop.f32.mrf.mxu3  ;;  %2121 = vmatpush.bf16.msra.mxu0 %v2735_v40 }
 0x1fd   : > { %v1427_v11 = vadd.f32 %v2791_v36, %v1426_v19 }
 0x1ff   : > { %v3634_v22 = vadd.f32 %v1427_v11, %v3166_v60 }
 0x200   : > { %2122 = vmatpush.bf16.msra.mxu0 %v2734_v41 }
 0x204   : > { %v1428_v20 = vpop.f32.mrf.mxu3  ;;  %2123 = vmatpush.bf16.msra.mxu0 %v2733_v47 }
 0x205   : > { %v1429_v63 = vadd.f32 %v2791_v36, %v1428_v20 }
 0x207   : > { %v3637_v23 = vadd.f32 %v1429_v63, %v3172_v5 }
 0x208   : > { %2124 = vmatpush.bf16.msra.mxu0 %v2732_v18 }
 0x209   : > { %v1450_v56 = vpack.c.bf16 %v3637_v23, %v3634_v22 }
 0x20b   : > { %1568 = vmatmul.bf16.gmra.mxu0 %v1450_v56  ;;  %1824 = vmatmul.bf16.gmra.mxu3 %v1450_v56 }
 0x20c   : > { %1853 = vmatmul.bf16.gmra.mxu2 %v1450_v56  ;;  %v1431_v27 = vpop.f32.mrf.mxu3  ;;  %2125 = vmatpush.bf16.msra.mxu0 %v2731_v49 }
 0x20d   : > { %v1432_v24 = vadd.f32 %v2791_v36, %v1431_v27  ;;  %v3713_v27 = vperm.slane %v1725_v30, 1 }
 0x20f   : > { %v3642_v28 = vadd.f32 %v1432_v24, %v3170_v4 }
 0x210   : > { %2126 = vmatpush.bf16.msra.mxu0 %v2730_v0 }
 0x214   : > { %v1433_v25 = vpop.f32.mrf.mxu3  ;;  %2127 = vmatpush.bf16.msra.mxu0 %v2729_v54 }
 0x215   : > { %v1434_v26 = vadd.f32 %v2791_v36, %v1433_v25 }
 0x217   : > { %v3645_v31 = vadd.f32 %v1434_v26, %v3178_v14 }
 0x218   : > { %2128 = vmatpush.bf16.msra.mxu0 %v2728_v17 }
 0x219   : > { %v1451_v12 = vpack.c.bf16 %v3645_v31, %v3642_v28 }
 0x21b   : > { %1573 = vmatmul.bf16.gmra.mxu0 %v1451_v12  ;;  %1602 = vmatmul.bf16.vlgmr.msrb.gmra.mxu1 %v1451_v12 }
 0x21c   : > { %1829 = vmatmul.bf16.gmra.mxu3 %v1451_v12  ;;  %1858 = vmatmul.bf16.gmra.mxu2 %v1451_v12  ;;  %v1436_v33 = vpop.f32.mrf.mxu3 }
 0x21d   : > { %v1437_v34 = vadd.f32 %v2791_v36, %v1436_v33 }
 0x21f   : > { %v3650_v37 = vadd.f32 %v1437_v34, %v3176_v13 }
 0x224   : > { %v1438_v7 = vpop.f32.mrf.mxu3 }
 0x225   : > { %v1439_v46 = vadd.f32 %v2791_v36, %v1438_v7 }
 0x227   : > { %v3653_v38 = vadd.f32 %v1439_v46, %v3182_v21 }
 0x229   : > { %v1452_v35 = vpack.c.bf16 %v3653_v38, %v3650_v37 }
 0x22b   : > { %1578 = vmatmul.bf16.gmra.mxu0 %v1452_v35  ;;  %1607 = vmatmul.bf16.gmra.mxu1 %v1452_v35 }
 0x22c   : > { %1834 = vmatmul.bf16.gmra.mxu3 %v1452_v35  ;;  %1863 = vmatmul.bf16.gmra.mxu2 %v1452_v35 }
 0x23b   : > { %1592 = vmatmul.bf16.vlgmr.msrb.gmra.mxu0 %v1449_v53 }
 0x24b   : > { %1597 = vmatmul.bf16.gmra.mxu0 %v1450_v56 }
 0x278   : > { %v1564_v39 = vpop.f32.mrf.mxu0 }
 0x279   : > { %v3681_v45 = vadd.f32 %v1564_v39, %v3672_v43 }
 0x27b   : > { %v1613_v58 = vmul.f32 -4.0, %v3681_v45 }
 0x27d   : > { %v1629_v36 = vmul.f32 1.442695, %v1613_v58  ;;  %v3730_v58 = vperm.slane %v3666_v42, 1 }
 0x27e   : > { %v1820_v62 = vpop.f32.mrf.mxu3 }
 0x27f   : > { %v3693_v48 = vadd.f32 %v1820_v62, %v3686_v51  ;;  %v1849_v32 = vpop.f32.mrf.mxu2  ;;  %2825 = vpow2.f32 %v1629_v36 }
 0x280   : > { %v1566_v1 = vpop.f32.mrf.mxu0  ;;  %v3721_v34 = vadd.f32 %v1849_v32, %v3713_v27 }
 0x281   : > { %v1869_v2 = vmul.f32 -4.0, %v3693_v48  ;;  %v3697_v29 = vadd.f32 %v1566_v1, %v3672_v43 }
 0x282   : > { %v1870_v39 = vmul.f32 -4.0, %v3721_v34 }
 0x283   : > { %v1885_v3 = vmul.f32 1.442695, %v1869_v2  ;;  %v1615_v6 = vmul.f32 -4.0, %v3697_v29 }
 0x284   : > { %v1887_v2 = vmul.f32 1.442695, %v1870_v39 }
 0x285   : > { %2827 = vpow2.f32 %v1885_v3  ;;  %v1633_v61 = vmul.f32 1.442695, %v1615_v6  ;;  %v2826_v15 = vpop.eup %2825 }
 0x286   : > { %v1822_v57 = vpop.f32.mrf.mxu3  ;;  %v1661_v20 = vadd.f32 1.0, %v2826_v15 }
 0x287   : > { %2829 = vpow2.f32 %v1633_v61  ;;  %v1823_v53 = vadd.f32 %v1822_v57, %v3686_v51  ;;  %v3707_v9 = vpop.f32.mrf.mxu2 }
 0x288   : > { %v1569_v55 = vpop.f32.mrf.mxu0 }
 0x289   : > { %v1871_v10 = vmul.f32 -4.0, %v1823_v53  ;;  %v3710_v19 = vadd.f32 %v1569_v55, %v3672_v43 }
 0x28b   : > { %v2828_v52 = vpop.eup %2827  ;;  %v1889_v16 = vmul.f32 1.442695, %v1871_v10  ;;  %v1617_v63 = vmul.f32 -4.0, %v3710_v19 }
 0x28c   : > { %v1917_v56 = vadd.f32 1.0, %v2828_v52 }
 0x28d   : > { %v2830_v11 = vpop.eup %2829  ;;  %2831 = vpow2.f32 %v1889_v16  ;;  %v1637_v26 = vmul.f32 1.442695, %v1617_v63 }
 0x28e   : > { %v1663_v24 = vadd.f32 1.0, %v2830_v11  ;;  %v1825_v25 = vpop.f32.mrf.mxu3  ;;  %2833 = vrcp.f32 %v1661_v20 }
 0x28f   : > { %v3716_v12 = vadd.f32 %v1825_v25, %v3686_v51  ;;  %v3718_v33 = vpop.f32.mrf.mxu2  ;;  %2835 = vrcp.f32 %v1917_v56 }
 0x290   : > { %v1571_v7 = vpop.f32.mrf.mxu0  ;;  %2837 = vrcp.f32 %v1663_v24 }
 0x291   : > { %v1873_v35 = vmul.f32 -4.0, %v3716_v12  ;;  %v3725_v40 = vadd.f32 %v1571_v7, %v3672_v43  ;;  %2839 = vpow2.f32 %v1637_v26 }
 0x293   : > { %v2832_v46 = vpop.eup %2831  ;;  %v1893_v47 = vmul.f32 1.442695, %v1873_v35  ;;  %v1619_v18 = vmul.f32 -4.0, %v3725_v40 }
 0x294   : > { %v1919_v41 = vadd.f32 1.0, %v2832_v46  ;;  %v2834_v30 = vpop.eup %2833 }
 0x295   : > { %v1641_v49 = vmul.f32 1.442695, %v1619_v18  ;;  %v2836_v62 = vpop.eup %2835  ;;  %v1693_v15 = vmul.f32 %v2834_v30, %v3681_v45 }
 0x296   : > { %2841 = vrcp.f32 %v1919_v41  ;;  %v1827_v0 = vpop.f32.mrf.mxu3  ;;  %v2838_v32 = vpop.eup %2837  ;;  %v1949_v61 = vmul.f32 %v2836_v62, %v3693_v48 }
 0x297   : > { %2843 = vpow2.f32 %v1893_v47  ;;  %v3733_v36 = vadd.f32 %v1827_v0, %v3686_v51  ;;  %v3735_v1 = vpop.f32.mrf.mxu2  ;;  %v2840_v6 = vpop.eup %2839  ;;  %v1695_v55 = vmul.f32 %v2838_v32, %v3697_v29 }
 0x298   : > { %2845 = vpow2.f32 %v1641_v49  ;;  %v1574_v54 = vpop.f32.mrf.mxu0  ;;  %v1603_v3 = vpop.f32.mrf.mxu1  ;;  %v1665_v63 = vadd.f32 1.0, %v2840_v6  ;;  %v1965_v56 = vadd.f32 %v1949_v61, %v1693_v15 }
 0x299   : > { %v1875_v57 = vmul.f32 -4.0, %v3733_v36  ;;  %v3740_v42 = vadd.f32 %v1574_v54, %v3672_v43  ;;  %v3743_v17 = vadd.f32 %v1603_v3, %v3730_v58  ;;  %2847 = vpow2.f32 %v1887_v2  ;;  %v2743_v3 = vld [vmem:[%s3955_s15 + $0x78] sm:$0xff] }
 0x29a   : > { %2150 = vmatpush.bf16.msra.mxu1 %v2743_v3 }
 0x29b   : > { %v1897_v11 = vmul.f32 1.442695, %v1875_v57  ;;  %v1621_v20 = vmul.f32 -4.0, %v3740_v42  ;;  %v1622_v48 = vmul.f32 -4.0, %v3743_v17 }
 0x29c   : > { %v2842_v10 = vpop.eup %2841 }
 0x29d   : > { %v2844_v52 = vpop.eup %2843  ;;  %v1951_v16 = vmul.f32 %v2842_v10, %v1823_v53  ;;  %2849 = vpow2.f32 %v1897_v11  ;;  %v1645_v7 = vmul.f32 1.442695, %v1621_v20  ;;  %v1647_v35 = vmul.f32 1.442695, %v1622_v48  ;;  %v2742_v48 = vld [vmem:[%s3955_s15 + $0x70] sm:$0xff] }
 0x29e   : > { %v1921_v25 = vadd.f32 1.0, %v2844_v52  ;;  %v2846_v26 = vpop.eup %2845  ;;  %2851 = vrcp.f32 %v1665_v63  ;;  %2151 = vmatpush.bf16.msra.mxu1 %v2742_v48 }
 0x29f   : > { %v1967_v24 = vadd.f32 %v1951_v16, %v1695_v55  ;;  %v1830_v45 = vpop.f32.mrf.mxu3  ;;  %v1859_v41 = vpop.f32.mrf.mxu2  ;;  %v1667_v39 = vadd.f32 1.0, %v2846_v26 }
 0x2a0   : > { %v3750_v29 = vadd.f32 %v1830_v45, %v3686_v51  ;;  %v3753_v53 = vadd.f32 %v1859_v41, %v3713_v27  ;;  %v1576_v47 = vpop.f32.mrf.mxu0  ;;  %v1605_v18 = vpop.f32.mrf.mxu1  ;;  %2853 = vrcp.f32 %v1921_v25 }
 0x2a1   : > { %v1981_v46 = vpack.c.bf16 %v1967_v24, %v1965_v56  ;;  %v3756_v30 = vadd.f32 %v1576_v47, %v3672_v43  ;;  %v3759_v49 = vadd.f32 %v1605_v18, %v3730_v58  ;;  %v2848_v62 = vpop.eup %2847  ;;  %2855 = vpow2.f32 %v1645_v7 }
 0x2a2   : > { %v1877_v0 = vmul.f32 -4.0, %v3750_v29  ;;  %v1878_v32 = vmul.f32 -4.0, %v3753_v53  ;;  %2857 = vpow2.f32 %v1647_v35  ;;  %v1918_v52 = vadd.f32 1.0, %v2848_v62 }
 0x2a3   : > { %2129 = vmatmul.bf16.vlgmr.msra.gmra.mxu0 %v1981_v46  ;;  %v2850_v2 = vpop.eup %2849  ;;  %v1623_v54 = vmul.f32 -4.0, %v3756_v30  ;;  %v1624_v10 = vmul.f32 -4.0, %v3759_v49  ;;  %2859 = vrcp.f32 %v1667_v39 }
 0x2a4   : > { %v1923_v6 = vadd.f32 1.0, %v2850_v2  ;;  %v1901_v61 = vmul.f32 1.442695, %v1877_v0  ;;  %v1903_v57 = vmul.f32 1.442695, %v1878_v32  ;;  %v2852_v55 = vpop.eup %2851  ;;  %v2741_v2 = vld [vmem:[%s3955_s15 + $0x68] sm:$0xff] }
 0x2a5   : > { %v1649_v15 = vmul.f32 1.442695, %v1623_v54  ;;  %v1651_v56 = vmul.f32 1.442695, %v1624_v10  ;;  %v1697_v10 = vmul.f32 %v2852_v55, %v3710_v19  ;;  %2152 = vmatpush.bf16.msra.mxu1 %v2741_v2  ;;  %v2740_v19 = vld [vmem:[%s3955_s15 + $0x60] sm:$0xff] }
 0x2a6   : > { %2861 = vrcp.f32 %v1923_v6  ;;  %v2854_v16 = vpop.eup %2853 }
 0x2a7   : > { %2863 = vpow2.f32 %v1901_v61  ;;  %v1832_v11 = vpop.f32.mrf.mxu3  ;;  %v1861_v20 = vpop.f32.mrf.mxu2 }
 0x2a8   : > { %v2856_v63 = vpop.eup %2855  ;;  %2865 = vpow2.f32 %v1903_v57  ;;  %v3772_v24 = vadd.f32 %v1832_v11, %v3686_v51  ;;  %v3775_v25 = vadd.f32 %v1861_v20, %v3713_v27  ;;  %v1579_v26 = vpop.f32.mrf.mxu0  ;;  %v3792_v57 = vadd.f32 %v3707_v9, %v3713_v27 }
 0x2a9   : > { %v1608_v7 = vpop.f32.mrf.mxu1  ;;  %v2858_v46 = vpop.eup %2857  ;;  %v1669_v35 = vadd.f32 1.0, %v2856_v63  ;;  %2867 = vpow2.f32 %v1649_v15  ;;  %v3778_v45 = vadd.f32 %v1579_v26, %v3672_v43  ;;  %v1953_v11 = vmul.f32 %v2854_v16, %v3716_v12  ;;  %2153 = vmatpush.bf16.msra.mxu1 %v2740_v19 }
 0x2aa   : > { %v3781_v41 = vadd.f32 %v1608_v7, %v3730_v58  ;;  %2869 = vrcp.f32 %v1918_v52  ;;  %v1670_v47 = vadd.f32 1.0, %v2858_v46  ;;  %v1879_v18 = vmul.f32 -4.0, %v3772_v24  ;;  %v2860_v62 = vpop.eup %2859 }
 0x2ab   : > { %v1880_v39 = vmul.f32 -4.0, %v3775_v25  ;;  %2871 = vrcp.f32 %v1669_v35  ;;  %v1625_v0 = vmul.f32 -4.0, %v3778_v45  ;;  %v1699_v20 = vmul.f32 %v2860_v62, %v3725_v40 }
 0x2ac   : > { %v1626_v32 = vmul.f32 -4.0, %v3781_v41  ;;  %v2862_v54 = vpop.eup %2861  ;;  %2873 = vrcp.f32 %v1670_v47  ;;  %v1905_v3 = vmul.f32 1.442695, %v1879_v18 }
 0x2ad   : > { %v1907_v6 = vmul.f32 1.442695, %v1880_v39  ;;  %v2864_v61 = vpop.eup %2863  ;;  %v1955_v15 = vmul.f32 %v2862_v54, %v3733_v36  ;;  %2875 = vpow2.f32 %v1651_v56  ;;  %v1653_v7 = vmul.f32 1.442695, %v1625_v0 }
 0x2ae   : > { %v2866_v52 = vpop.eup %2865  ;;  %v1925_v48 = vadd.f32 1.0, %v2864_v61  ;;  %2877 = vpow2.f32 %v1905_v3  ;;  %v1655_v46 = vmul.f32 1.442695, %v1626_v32  ;;  %v1872_v32 = vmul.f32 -4.0, %v3792_v57 }
 0x2af   : > { %v2868_v63 = vpop.eup %2867  ;;  %v1926_v26 = vadd.f32 1.0, %v2866_v52  ;;  %2879 = vpow2.f32 %v1907_v6  ;;  %v1835_v9 = vpop.f32.mrf.mxu3  ;;  %v1971_v62 = vadd.f32 %v1955_v15, %v1699_v20  ;;  %v3822_v6 = vadd.f32 %v3718_v33, %v3713_v27  ;;  %v2739_v15 = vld [vmem:[%s3955_s15 + $0x58] sm:$0xff] }
 0x2b0   : > { %v1864_v35 = vpop.f32.mrf.mxu2  ;;  %v3801_v36 = vpop.eup %2869  ;;  %2881 = vrcp.f32 %v1925_v48  ;;  %v1671_v55 = vadd.f32 1.0, %v2868_v63  ;;  %v3804_v12 = vadd.f32 %v1835_v9, %v3686_v51  ;;  %v1969_v61 = vadd.f32 %v1953_v11, %v1697_v10  ;;  %2154 = vmatpush.bf16.msra.mxu1 %v2739_v15 }
 0x2b1   : > { %v3807_v40 = vadd.f32 %v1864_v35, %v3713_v27  ;;  %v1581_v16 = vpop.f32.mrf.mxu0  ;;  %v1610_v56 = vpop.f32.mrf.mxu1  ;;  %2883 = vrcp.f32 %v1926_v26  ;;  %v1891_v10 = vmul.f32 1.442695, %v1872_v32  ;;  %v1874_v11 = vmul.f32 -4.0, %v3822_v6 }
 0x2b2   : > { %v3809_v47 = vpop.eup %2871  ;;  %v3812_v18 = vadd.f32 %v1581_v16, %v3672_v43  ;;  %v3815_v39 = vadd.f32 %v1610_v56, %v3730_v58  ;;  %2885 = vrcp.f32 %v1671_v55  ;;  %v1881_v2 = vmul.f32 -4.0, %v3804_v12 }
 0x2b3   : > { %v2874_v0 = vpop.eup %2873  ;;  %v1882_v54 = vmul.f32 -4.0, %v3807_v40  ;;  %2887 = vpow2.f32 %v1653_v7  ;;  %v1983_v35 = vpack.c.bf16 %v1971_v62, %v1969_v61 }
 0x2b4   : > { %v2876_v3 = vpop.eup %2875  ;;  %v1627_v43 = vmul.f32 -4.0, %v3812_v18  ;;  %2889 = vpow2.f32 %v1655_v46  ;;  %v1909_v26 = vmul.f32 1.442695, %v1881_v2  ;;  %v1628_v9 = vmul.f32 -4.0, %v3815_v39  ;;  %v2738_v2 = vld [vmem:[%s3955_s15 + $0x50] sm:$0xff] }
 0x2b5   : > { %v2878_v52 = vpop.eup %2877  ;;  %v1672_v20 = vadd.f32 1.0, %v2876_v3  ;;  %v1911_v19 = vmul.f32 1.442695, %v1882_v54  ;;  %2134 = vmatmul.bf16.gmra.mxu0 %v1983_v35  ;;  %2155 = vmatpush.bf16.msra.mxu1 %v2738_v2 }
 0x2b6   : > { %v2880_v48 = vpop.eup %2879  ;;  %v1927_v63 = vadd.f32 1.0, %v2878_v52  ;;  %v1657_v16 = vmul.f32 1.442695, %v1627_v43  ;;  %v1702_v43 = vmul.f32 %v2874_v0, %v3743_v17  ;;  %v1659_v52 = vmul.f32 1.442695, %v1628_v9  ;;  %v2737_v17 = vld [vmem:[%s3955_s15 + $0x48] sm:$0xff] }
 0x2b7   : > { %v2882_v33 = vpop.eup %2881  ;;  %2891 = vrcp.f32 %v1672_v20  ;;  %v1928_v7 = vadd.f32 1.0, %v2880_v48  ;;  %v1837_v56 = vpop.f32.mrf.mxu3 }
 0x2b8   : > { %v2884_v55 = vpop.eup %2883  ;;  %2893 = vrcp.f32 %v1927_v63  ;;  %v1866_v46 = vpop.f32.mrf.mxu2  ;;  %v3835_v61 = vadd.f32 %v1837_v56, %v3686_v51  ;;  %v1895_v56 = vmul.f32 1.442695, %v1874_v11 }
 0x2b9   : > { %v2886_v3 = vpop.eup %2885  ;;  %v1958_v62 = vmul.f32 %v2884_v55, %v3753_v53  ;;  %2895 = vrcp.f32 %v1928_v7  ;;  %v3838_v32 = vadd.f32 %v1866_v46, %v3713_v27  ;;  %v1593_v54 = vpop.f32.mrf.mxu0  ;;  %v1957_v53 = vmul.f32 %v2882_v33, %v3750_v29  ;;  %2156 = vmatpush.bf16.msra.mxu1 %v2737_v17 }
 0x2ba   : > { %v2888_v15 = vpop.eup %2887  ;;  %2897 = vpow2.f32 %v1909_v26  ;;  %v3842_v20 = vadd.f32 %v1593_v54, %v3730_v58  ;;  %v1883_v51 = vmul.f32 -4.0, %v3835_v61  ;;  %v1701_v33 = vmul.f32 %v3809_v47, %v3740_v42  ;;  %v2736_v42 = vld [vmem:[%s3955_s15 + $0x40] sm:$0xff] }
 0x2bb   : > { %v2890_v48 = vpop.eup %2889  ;;  %2899 = vpow2.f32 %v1911_v19  ;;  %v1884_v63 = vmul.f32 -4.0, %v3838_v32  ;;  %v3851_v0 = vadd.f32 %v1958_v62, %v1702_v43  ;;  %v1703_v46 = vmul.f32 %v2886_v3, %v3756_v30 }
 0x2bc   : > { %v1674_v35 = vadd.f32 1.0, %v2890_v48  ;;  %2901 = vpow2.f32 %v1657_v16  ;;  %v1614_v7 = vmul.f32 -4.0, %v3842_v20  ;;  %v1913_v9 = vmul.f32 1.442695, %v1883_v51 }
 0x2bd   : > { %v2892_v26 = vpop.eup %2891  ;;  %2903 = vpow2.f32 %v1891_v10  ;;  %v1915_v55 = vmul.f32 1.442695, %v1884_v63  ;;  %v1973_v43 = vadd.f32 %v1957_v53, %v1701_v33  ;;  %v1673_v48 = vadd.f32 1.0, %v2888_v15  ;;  %2157 = vmatpush.bf16.msra.mxu1 %v2736_v42 }
 0x2be   : > { %v2894_v29 = vpop.eup %2893  ;;  %2905 = vrcp.f32 %v1674_v35  ;;  %v1631_v19 = vmul.f32 1.442695, %v1614_v7  ;;  %v1704_v54 = vmul.f32 %v2892_v26, %v3759_v49  ;;  %v3872_v26 = vadd.f32 %v3735_v1, %v3713_v27 }
 0x2bf   : > { %v2896_v16 = vpop.eup %2895  ;;  %v1959_v2 = vmul.f32 %v2894_v29, %v3772_v24  ;;  %2907 = vpow2.f32 %v1659_v52 }
 0x2c0   : > { %v2898_v62 = vpop.eup %2897  ;;  %v1960_v10 = vmul.f32 %v2896_v16, %v3775_v25  ;;  %2909 = vpow2.f32 %v1913_v9 }
 0x2c1   : > { %v2900_v47 = vpop.eup %2899  ;;  %v1929_v51 = vadd.f32 1.0, %v2898_v62  ;;  %2911 = vpow2.f32 %v1915_v55  ;;  %v1595_v11 = vpop.f32.mrf.mxu0  ;;  %v1975_v30 = vadd.f32 %v1959_v2, %v1703_v46  ;;  %v1876_v2 = vmul.f32 -4.0, %v3872_v26 }
 0x2c2   : > { %v2902_v3 = vpop.eup %2901  ;;  %v1930_v24 = vadd.f32 1.0, %v2900_v47  ;;  %2913 = vpow2.f32 %v1631_v19  ;;  %v3863_v52 = vadd.f32 %v1595_v11, %v3730_v58  ;;  %v3865_v49 = vadd.f32 %v1960_v10, %v1704_v54 }
 0x2c3   : > { %v2904_v25 = vpop.eup %2903  ;;  %2915 = vpow2.f32 %v1895_v56  ;;  %v1675_v53 = vadd.f32 1.0, %v2902_v3  ;;  %v1985_v35 = vpack.c.bf16 %v1975_v30, %v1973_v43  ;;  %v1899_v11 = vmul.f32 1.442695, %v1876_v2 }
 0x2c4   : > { %v2906_v63 = vpop.eup %2905  ;;  %2917 = vrcp.f32 %v1930_v24  ;;  %v1616_v15 = vmul.f32 -4.0, %v3863_v52  ;;  %v1986_v7 = vpack.c.bf16 %v3865_v49, %v3851_v0 }
 0x2c5   : > { %v2908_v17 = vpop.eup %2907  ;;  %2919 = vrcp.f32 %v1929_v51  ;;  %2139 = vmatmul.bf16.gmra.mxu0 %v1985_v35  ;;  %v1706_v43 = vmul.f32 %v2906_v63, %v3781_v41  ;;  %v1920_v35 = vadd.f32 1.0, %v2904_v25 }
 0x2c6   : > { %v2910_v9 = vpop.eup %2909  ;;  %2921 = vrcp.f32 %v1673_v48  ;;  %v1676_v55 = vadd.f32 1.0, %v2908_v17  ;;  %v1635_v56 = vmul.f32 1.442695, %v1616_v15 }
 0x2c7   : > { %v2912_v29 = vpop.eup %2911  ;;  %2923 = vrcp.f32 %v1675_v53  ;;  %v1931_v33 = vadd.f32 1.0, %v2910_v9 }
 0x2c8   : > { %v2914_v19 = vpop.eup %2913  ;;  %2925 = vrcp.f32 %v1676_v55  ;;  %v1932_v16 = vadd.f32 1.0, %v2912_v29  ;;  %v1950_v55 = vmul.f32 %v3801_v36, %v3721_v34 }
 0x2c9   : > { %v2916_v46 = vpop.eup %2915  ;;  %2927 = vrcp.f32 %v1931_v33  ;;  %v1662_v62 = vadd.f32 1.0, %v2914_v19  ;;  %v1598_v54 = vpop.f32.mrf.mxu0 }
 0x2ca   : > { %v2918_v27 = vpop.eup %2917  ;;  %2929 = vrcp.f32 %v1932_v16  ;;  %v1599_v1 = vadd.f32 %v1598_v54, %v3730_v58 }
 0x2cb   : > { %v2920_v10 = vpop.eup %2919  ;;  %v1962_v42 = vmul.f32 %v2918_v27, %v3807_v40  ;;  %2931 = vrcp.f32 %v1662_v62 }
 0x2cc   : > { %v2922_v47 = vpop.eup %2921  ;;  %2933 = vpow2.f32 %v1635_v56  ;;  %v1618_v48 = vmul.f32 -4.0, %v1599_v1  ;;  %v1961_v24 = vmul.f32 %v2920_v10, %v3804_v12 }
 0x2cd   : > { %v2924_v51 = vpop.eup %2923  ;;  %v3878_v30 = vadd.f32 %v1962_v42, %v1706_v43  ;;  %v1705_v9 = vmul.f32 %v2922_v47, %v3778_v45 }
 0x2ce   : > { %v2926_v3 = vpop.eup %2925  ;;  %v1639_v53 = vmul.f32 1.442695, %v1618_v48  ;;  %v1707_v41 = vmul.f32 %v2924_v51, %v3812_v18 }
 0x2cf   : > { %v2928_v15 = vpop.eup %2927  ;;  %v1708_v29 = vmul.f32 %v2926_v3, %v3815_v39  ;;  %v1977_v16 = vadd.f32 %v1961_v24, %v1705_v9 }
 0x2d0   : > { %v2930_v17 = vpop.eup %2929  ;;  %v1963_v40 = vmul.f32 %v2928_v15, %v3835_v61  ;;  %2935 = vpow2.f32 %v1639_v53  ;;  %v1922_v61 = vadd.f32 1.0, %v2916_v46 }
 0x2d1   : > { %v2932_v63 = vpop.eup %2931  ;;  %2937 = vpow2.f32 %v1899_v11  ;;  %v1964_v12 = vmul.f32 %v2930_v17, %v3838_v32  ;;  %v1600_v33 = vpop.f32.mrf.mxu0 }
 0x2d2   : > { %v2934_v19 = vpop.eup %2933  ;;  %v1694_v25 = vmul.f32 %v2932_v63, %v3842_v20  ;;  %v1601_v45 = vadd.f32 %v1600_v33, %v3730_v58  ;;  %v1979_v18 = vadd.f32 %v1963_v40, %v1707_v41  ;;  %2939 = vrcp.f32 %v1920_v35 }
 0x2d3   : > { %v1664_v56 = vadd.f32 1.0, %v2934_v19  ;;  %v1980_v2 = vadd.f32 %v1964_v12, %v1708_v29 }
 0x2d4   : > { %v1966_v62 = vadd.f32 %v1950_v55, %v1694_v25  ;;  %v1620_v54 = vmul.f32 -4.0, %v1601_v45  ;;  %v1987_v34 = vpack.c.bf16 %v1979_v18, %v1977_v16 }
 0x2d5   : > { %2941 = vrcp.f32 %v1664_v56  ;;  %v1988_v36 = vpack.c.bf16 %v1980_v2, %v3878_v30 }
 0x2d6   : > { %v2936_v39 = vpop.eup %2935  ;;  %v1643_v32 = vmul.f32 1.442695, %v1620_v54  ;;  %2943 = vrcp.f32 %v1922_v61  ;;  %2144 = vmatmul.bf16.gmra.mxu0 %v1987_v34 }
 0x2d7   : > { %v2938_v27 = vpop.eup %2937  ;;  %v1666_v10 = vadd.f32 1.0, %v2936_v39 }
 0x2d8   : > { %2945 = vpow2.f32 %v1643_v32  ;;  %v2940_v58 = vpop.eup %2939  ;;  %v1924_v43 = vadd.f32 1.0, %v2938_v27 }
 0x2d9   : > { %2947 = vrcp.f32 %v1666_v10  ;;  %v1952_v46 = vmul.f32 %v2940_v58, %v3792_v57 }
 0x2da   : > { %2949 = vrcp.f32 %v1924_v43 }
 0x2db   : > { %v2942_v20 = vpop.eup %2941 }
 0x2dc   : > { %v1696_v42 = vmul.f32 %v2942_v20, %v3863_v52  ;;  %v2944_v47 = vpop.eup %2943 }
 0x2dd   : > { %v1954_v3 = vmul.f32 %v2944_v47, %v3822_v6 }
 0x2de   : > { %v2946_v48 = vpop.eup %2945  ;;  %v1968_v51 = vadd.f32 %v1952_v46, %v1696_v42 }
 0x2df   : > { %v2948_v11 = vpop.eup %2947  ;;  %v1668_v30 = vadd.f32 1.0, %v2946_v48 }
 0x2e0   : > { %v1982_v24 = vpack.c.bf16 %v1968_v51, %v1966_v62  ;;  %v1698_v53 = vmul.f32 %v2948_v11, %v1599_v1  ;;  %v2950_v35 = vpop.eup %2949  ;;  %v2792_v1 = vld [vmem:[%s3956_s16] ss:$0 sm:$0xff] }
 0x2e1   : > { %2951 = vrcp.f32 %v1668_v30  ;;  %v1956_v57 = vmul.f32 %v2950_v35, %v3872_v26 }
 0x2e2   : > { %2158 = vmatmul.bf16.vlgmr.msra.gmra.mxu1 %v1982_v24  ;;  %v1970_v15 = vadd.f32 %v1954_v3, %v1698_v53 }
 0x2e7   : > { %v2952_v17 = vpop.eup %2951 }
 0x2e8   : > { %v1700_v9 = vmul.f32 %v2952_v17, %v1601_v45 }
 0x2ea   : > { %v1972_v52 = vadd.f32 %v1956_v57, %v1700_v9 }
 0x2ec   : > { %v1984_v41 = vpack.c.bf16 %v1972_v52, %v1970_v15 }
 0x2f2   : > { %2163 = vmatmul.bf16.gmra.mxu1 %v1984_v41 }
 0x302   : > { %2168 = vmatmul.bf16.gmra.mxu1 %v1986_v7 }
 0x312   : > { %2173 = vmatmul.bf16.gmra.mxu1 %v1988_v36 }
 0x320   : > { %v2130_v6 = vpop.f32.mrf.mxu0 }
 0x321   : > { %v2131_v63 = vadd.f32 %v2792_v1, %v2130_v6 }
 0x328   : > { %v2132_v40 = vpop.f32.mrf.mxu0 }
 0x329   : > { %v2133_v49 = vadd.f32 %v2792_v1, %v2132_v40 }
 0x332   : > { %v2135_v12 = vpop.f32.mrf.mxu0 }
 0x333   : > { %v2136_v45 = vadd.f32 %v2792_v1, %v2135_v12 }
 0x33a   : > { %v2137_v25 = vpop.f32.mrf.mxu0 }
 0x33b   : > { %v2138_v2 = vadd.f32 %v2792_v1, %v2137_v25 }
 0x35f   : > { %v2159_v55 = vpop.f32.mrf.mxu1 }
 0x360   : > { %v2160_v29 = vadd.f32 %v2159_v55, %v2131_v63 }
 0x362   : > { %v2179_v26 = vadd.f32 %v2160_v29, %v3614_v44 }
 0x364   : > { %v2187_v0 = vadd.f32 %v2179_v26, %v3161_v50  ;;  %v2140_v50 = vpop.f32.mrf.mxu0 }
 0x366   : > { %2195 = vst [vmem:[%s3906_s29] sm:$0xff] %v2187_v0 }
 0x367   : > { %v2161_v7 = vpop.f32.mrf.mxu1 }
 0x368   : > { %v2162_v33 = vadd.f32 %v2161_v7, %v2133_v49 }
 0x36a   : > { %v2180_v19 = vadd.f32 %v2162_v33, %v3617_v8 }
 0x36c   : > { %v2188_v44 = vadd.f32 %v2180_v19, %v3164_v59  ;;  %v2141_v59 = vadd.f32 %v2792_v1, %v2140_v50  ;;  %v2142_v36 = vpop.f32.mrf.mxu0 }
 0x36d   : > { %v2143_v27 = vadd.f32 %v2792_v1, %v2142_v36 }
 0x36e   : > { %2196 = vst [vmem:[%s3906_s29 + $0x8] sm:$0xff] %v2188_v44 }
 0x36f   : > { %v2164_v16 = vpop.f32.mrf.mxu1 }
 0x370   : > { %v2165_v18 = vadd.f32 %v2164_v16, %v2136_v45 }
 0x372   : > { %v2181_v61 = vadd.f32 %v2165_v18, %v3634_v22 }
 0x374   : > { %v2189_v56 = vadd.f32 %v2181_v61, %v3166_v60  ;;  %v2145_v20 = vpop.f32.mrf.mxu0 }
 0x375   : > { %v2146_v43 = vadd.f32 %v2792_v1, %v2145_v20 }
 0x376   : > { %2197 = vst [vmem:[%s3906_s29 + $0x10] sm:$0xff] %v2189_v56 }
 0x377   : > { %v2166_v62 = vpop.f32.mrf.mxu1 }
 0x378   : > { %v2167_v54 = vadd.f32 %v2166_v62, %v2138_v2 }
 0x37a   : > { %v2182_v8 = vadd.f32 %v2167_v54, %v3637_v23 }
 0x37c   : > { %v2190_v34 = vadd.f32 %v2182_v8, %v3172_v5 }
 0x37e   : > { %2198 = vst [vmem:[%s3906_s29 + $0x18] sm:$0xff] %v2190_v34 }
 0x37f   : > { %v2169_v39 = vpop.f32.mrf.mxu1 }
 0x380   : > { %v2170_v32 = vadd.f32 %v2169_v39, %v2141_v59 }
 0x382   : > { %v2183_v22 = vadd.f32 %v2170_v32, %v3642_v28  ;;  %v2147_v28 = vpop.f32.mrf.mxu0 }
 0x383   : > { %v2148_v48 = vadd.f32 %v2792_v1, %v2147_v28 }
 0x384   : > { %v2191_v60 = vadd.f32 %v2183_v22, %v3170_v4 }
 0x386   : > { %2199 = vst [vmem:[%s3906_s29 + $0x20] sm:$0xff] %v2191_v60 }
 0x387   : > { %v2171_v10 = vpop.f32.mrf.mxu1 }
 0x388   : > { %v2172_v58 = vadd.f32 %v2171_v10, %v2143_v27 }
 0x38a   : > { %v2184_v23 = vadd.f32 %v2172_v58, %v3645_v31 }
 0x38c   : > { %v2192_v5 = vadd.f32 %v2184_v23, %v3178_v14 }
 0x38e   : > { %2200 = vst [vmem:[%s3906_s29 + $0x28] sm:$0xff] %v2192_v5 }
 0x38f   : > { %v2174_v46 = vpop.f32.mrf.mxu1 }
 0x390   : > { %v2175_v42 = vadd.f32 %v2174_v46, %v2146_v43 }
 0x392   : > { %v2185_v47 = vadd.f32 %v2175_v42, %v3650_v37 }
 0x394   : > { %v2193_v4 = vadd.f32 %v2185_v47, %v3176_v13 }
 0x396   : > { %2201 = vst [vmem:[%s3906_s29 + $0x30] sm:$0xff] %v2193_v4 }
 0x397   : > { %v2176_v51 = vpop.f32.mrf.mxu1 }
 0x398   : > { %v2177_v11 = vadd.f32 %v2176_v51, %v2148_v48 }
 0x39a   : > { %v2186_v30 = vadd.f32 %v2177_v11, %v3653_v38 }
 0x39c   : > { %v2194_v3 = vadd.f32 %v2186_v30, %v3182_v21 }
 0x39e   : > { %2202 = vst [vmem:[%s3906_s29 + $0x38] sm:$0xff] %v2194_v3 }
 0x39f PF: > { %s27_s26 = sadd.s32 1, %s2975_s26   ;;  %s3962_s24 = smov %s2971_s25 }
 0x3a0   : > { %p24_p5 = scmp.ge.s32.totalorder %s27_s26, 4   ;;  %s3963_s25 = smov %s3965_s27 }
 0x3a2   :  { %26 = sbr.rel (!%p24_p5) target bundleno = 3 (0x3), region = 133 }

</bundles_post_ra>
